<compile_context>
chip_gen: v5e
topology: v5e:2x2
jax: 0.10.0
libtpu: 0.0.40
codegen_flags: <defaults>
</compile_context>

<pallas_src>
import math

import jax
import jax.numpy as jnp
from jax.experimental import pallas as pl
from jax.experimental.pallas import tpu as pltpu

# ---- small LlamaConfig-like constants ----
BATCH = 2
SEQ = 8
HIDDEN = 32
NUM_HEADS = 4
HEAD_DIM = HIDDEN // NUM_HEADS          # 8 (power of two)
QKV_DIM = NUM_HEADS * HEAD_DIM          # 32
INTERMEDIATE = 64
RMS_EPS = 1e-6
ROPE_THETA = 10000.0
NEG_INF = -1e30


def _rmsnorm(x, w, eps):
    var = jnp.mean(x * x, axis=-1, keepdims=True)
    return x * jax.lax.rsqrt(var + eps) * w


def _rope(t, cos, sin):
    """Reference rotate-half RoPE (HF convention)."""
    half = t.shape[-1] // 2
    t1 = t[..., :half]
    t2 = t[..., half:]
    rot = jnp.concatenate([-t2, t1], axis=-1)
    return t * cos + rot * sin


def decoder_layer_kernel(
    x_ref, cos_ref, sin_ref,
    ln1_ref, ln2_ref,
    w_qkv_ref, w_o_ref, w_gu_ref, w_d_ref,
    out_ref, k_out_ref, v_out_ref,
):
    """Whole decoder layer, fused. Processes all tokens of this grid step."""
    x = x_ref[...].astype(jnp.float32)                     # [T, H]
    tokens = x.shape[0]
    b_local = tokens // SEQ
    half = HEAD_DIM // 2

    # ---- input_layernorm (RMSNorm, f32) ----
    h = _rmsnorm(x, ln1_ref[...], RMS_EPS)

    # ---- fused QKV projection (bf16 MXU operands, f32 accumulation) ----
    qkv = jnp.dot(h.astype(w_qkv_ref.dtype), w_qkv_ref[...],
                  preferred_element_type=jnp.float32)      # [T, 3*QKV_DIM]
    q = qkv[:, :QKV_DIM]
    k = qkv[:, QKV_DIM:2 * QKV_DIM]
    v = qkv[:, 2 * QKV_DIM:]

    # ---- RoPE for all heads at once, in the token-major [T, nH*dH] layout.
    # rot_half(t)[h, d] = t[h, (d + dH/2) mod dH]; the -/+ sign is pre-folded
    # into the sin table on the host. The per-head rotation is realized with
    # two full-width lane shifts and a lane-select (HEAD_DIM is a power of 2).
    cos = cos_ref[...]                                     # [T, QKV_DIM]
    sin = sin_ref[...]                                     # [T, QKV_DIM] (sign-folded)
    lane = jax.lax.broadcasted_iota(jnp.int32, (1, QKV_DIM), 1)
    low = jnp.bitwise_and(lane, HEAD_DIM - 1) < half       # d < dH/2 within each head

    def rope(t):
        shift_l = jnp.concatenate([t[:, half:], t[:, :half]], axis=-1)   # t[:, g+half]
        shift_r = jnp.concatenate([t[:, -half:], t[:, :-half]], axis=-1)  # t[:, g-half]
        rot = jnp.where(low, shift_l, shift_r)
        return t * cos + rot * sin

    q = rope(q)
    k = rope(k)

    # ---- present K/V cache: one wide store per tensor (wrapper transposes
    # to [B, nH, S, dH] host-side).  TODO(synk): past_key_value concat and an
    # external additive attention_mask are not modeled; a fresh causal mask is
    # built in-kernel and the new K/V are returned as "present".
    k_out_ref[...] = k.astype(k_out_ref.dtype)
    v_out_ref[...] = v.astype(v_out_ref.dtype)

    # ---- head-batched attention over [nH*b_local, S, dH] ----
    # (layout plumbing via lane slices + leading-dim concat; 4-D transposes /
    # lane-changing reshapes are avoided on purpose — Mosaic lowering limits.)
    def split_heads(t):
        return jnp.concatenate(
            [t[:, hh * HEAD_DIM:(hh + 1) * HEAD_DIM].reshape(b_local, SEQ, HEAD_DIM)
             for hh in range(NUM_HEADS)], axis=0)          # [nH*b_local, S, dH]

    qh = split_heads(q).astype(jnp.bfloat16)
    kh = split_heads(k).astype(jnp.bfloat16)
    vh = split_heads(v).astype(jnp.bfloat16)

    nb = NUM_HEADS * b_local
    scores = jnp.einsum("bqd,bkd->bqk", qh, kh,
                        preferred_element_type=jnp.float32)  # [nb, S, S]
    qi = jax.lax.broadcasted_iota(jnp.int32, (nb, SEQ, SEQ), 1)
    ki = jax.lax.broadcasted_iota(jnp.int32, (nb, SEQ, SEQ), 2)
    scores = jnp.where(ki <= qi, scores, NEG_INF)

    m = jnp.max(scores, axis=-1, keepdims=True)
    p = jnp.exp(scores - m)
    p = p * pl.reciprocal(jnp.sum(p, axis=-1, keepdims=True), approx=True)
    ctx = jnp.einsum("bqk,bkd->bqd", p.astype(jnp.bfloat16), vh,
                     preferred_element_type=jnp.float32)   # [nb, S, dH]

    # back to token-major [T, nH*dH] for the output projection
    ctx_tok = jnp.concatenate(
        [ctx[hh * b_local:(hh + 1) * b_local].reshape(tokens, HEAD_DIM)
         for hh in range(NUM_HEADS)], axis=-1)

    attn_out = jnp.dot(ctx_tok.astype(w_o_ref.dtype), w_o_ref[...],
                       preferred_element_type=jnp.float32)
    h1 = x + attn_out                                      # residual add

    # ---- post_attention_layernorm + SwiGLU MLP (fused gate/up matmul) ----
    h2 = _rmsnorm(h1, ln2_ref[...], RMS_EPS)
    gu = jnp.dot(h2.astype(w_gu_ref.dtype), w_gu_ref[...],
                 preferred_element_type=jnp.float32)       # [T, 128] full-lane
    g = gu[:, :INTERMEDIATE]
    u = gu[:, INTERMEDIATE:]
    act = g * jax.nn.sigmoid(g)                            # SiLU, f32
    mlp_out = jnp.dot((act * u).astype(w_d_ref.dtype), w_d_ref[...],
                      preferred_element_type=jnp.float32)

    out_ref[...] = (h1 + mlp_out).astype(out_ref.dtype)    # residual add


def _rope_tables(position_ids):
    inv_freq = 1.0 / (
        ROPE_THETA ** (jnp.arange(0, HEAD_DIM, 2, dtype=jnp.float32) / HEAD_DIM)
    )
    freqs = position_ids.astype(jnp.float32)[:, None] * inv_freq[None, :]
    emb = jnp.concatenate([freqs, freqs], axis=-1)         # [S, dH]
    return jnp.cos(emb), jnp.sin(emb)


def neuron_llama_decoder_layer(hidden_states, params, position_ids=None,
                               *, batch_parallel=False):
    """batch_parallel=False collapses the grid to one step (best on single-TC
    v5e/v6e); batch_parallel=True keeps grid=(B,) "parallel" for v7x's 2 TCs."""
    # TODO(synk): tensor-parallel Column/RowParallelLinear is collapsed to the
    # single-device nn.Linear path (tp_degree == 1).
    B, S, H = hidden_states.shape
    if position_ids is None:
        position_ids = jnp.arange(S, dtype=jnp.int32)

    # host-side parameter prep (fused weights, folded scale, signed sin table)
    cos, sin = _rope_tables(position_ids)                  # [S, dH]
    sign = jnp.concatenate([-jnp.ones((HEAD_DIM // 2,), jnp.float32),
                            jnp.ones((HEAD_DIM // 2,), jnp.float32)])
    cos_full = jnp.tile(cos, (B, NUM_HEADS))               # [B*S, nH*dH]
    sin_full = jnp.tile(sin * sign[None, :], (B, NUM_HEADS))

    scale = 1.0 / math.sqrt(HEAD_DIM)
    w_qkv = jnp.concatenate(
        [params["wq"] * scale, params["wk"], params["wv"]], axis=1
    ).astype(jnp.bfloat16)                                 # [H, 3*nH*dH]
    w_gu = jnp.concatenate([params["wg"], params["wu"]], axis=1).astype(jnp.bfloat16)
    w_o = params["wo"].astype(jnp.bfloat16)
    w_d = params["wd"].astype(jnp.bfloat16)

    x_flat = hidden_states.reshape(B * S, H)
    total = B * S
    tb = S if batch_parallel else total
    grid = (total // tb,)

    def tok_spec(width):
        return pl.BlockSpec((tb, width), lambda b: (b, 0))

    def full(shape):
        return pl.BlockSpec(shape, lambda b, _s=shape: (0,) * len(_s))

    grid_spec = pltpu.PrefetchScalarGridSpec(
        num_scalar_prefetch=0,
        grid=grid,
        in_specs=[
            tok_spec(H), tok_spec(QKV_DIM), tok_spec(QKV_DIM),
            full((1, H)), full((1, H)),
            full((H, 3 * QKV_DIM)), full((QKV_DIM, H)),
            full((H, 2 * INTERMEDIATE)), full((INTERMEDIATE, H)),
        ],
        out_specs=[tok_spec(H), tok_spec(QKV_DIM), tok_spec(QKV_DIM)],
    )
    out_shapes = (
        jax.ShapeDtypeStruct((total, H), hidden_states.dtype),
        jax.ShapeDtypeStruct((total, QKV_DIM), hidden_states.dtype),
        jax.ShapeDtypeStruct((total, QKV_DIM), hidden_states.dtype),
    )
    out, k_tok, v_tok = pl.pallas_call(
        decoder_layer_kernel,
        out_shape=out_shapes,
        grid_spec=grid_spec,
        compiler_params=pltpu.CompilerParams(
            dimension_semantics=("parallel",) if batch_parallel else ("arbitrary",)),
    )(x_flat, cos_full, sin_full,
      params["ln1_w"], params["ln2_w"],
      w_qkv, w_o, w_gu, w_d)

    # host-side layout plumbing back to the HF layouts (free)
    out = out.reshape(B, S, H)
    k_cache = k_tok.reshape(B, S, NUM_HEADS, HEAD_DIM).transpose(0, 2, 1, 3)
    v_cache = v_tok.reshape(B, S, NUM_HEADS, HEAD_DIM).transpose(0, 2, 1, 3)
    # matches PyTorch: outputs = (hidden_states, present_key_value)
    return out, (k_cache, v_cache)


def reference_decoder_layer(hidden_states, params, position_ids=None):
    """Pure-JAX mirror of the PyTorch forward, for correctness checking."""
    B, S, H = hidden_states.shape
    if position_ids is None:
        position_ids = jnp.arange(S, dtype=jnp.int32)
    cos, sin = _rope_tables(position_ids)
    x = hidden_states.astype(jnp.float32)

    h = _rmsnorm(x, params["ln1_w"][0], RMS_EPS)
    q = (h @ params["wq"]).reshape(B, S, NUM_HEADS, HEAD_DIM)
    k = (h @ params["wk"]).reshape(B, S, NUM_HEADS, HEAD_DIM)
    v = (h @ params["wv"]).reshape(B, S, NUM_HEADS, HEAD_DIM)
    q = _rope(q, cos[None, :, None, :], sin[None, :, None, :])
    k = _rope(k, cos[None, :, None, :], sin[None, :, None, :])
    scores = jnp.einsum("bqhd,bkhd->bhqk", q, k) / math.sqrt(HEAD_DIM)
    causal = jnp.tril(jnp.ones((S, S), bool))
    scores = jnp.where(causal[None, None], scores, NEG_INF)
    p = jax.nn.softmax(scores, axis=-1)
    ctx = jnp.einsum("bhqk,bkhd->bqhd", p, v).reshape(B, S, NUM_HEADS * HEAD_DIM)
    attn_out = ctx @ params["wo"]
    h1 = x + attn_out
    h2 = _rmsnorm(h1, params["ln2_w"][0], RMS_EPS)
    g = h2 @ params["wg"]
    u = h2 @ params["wu"]
    mlp_out = (jax.nn.silu(g) * u) @ params["wd"]
    out = h1 + mlp_out
    kv = jnp.transpose(k, (0, 2, 1, 3)), jnp.transpose(v, (0, 2, 1, 3))
    return out, kv


def init_params(key):
    ks = jax.random.split(key, 10)
    w = lambda k, shape: 0.02 * jax.random.normal(k, shape, jnp.float32)
    return {
        "ln1_w": 1.0 + 0.1 * jax.random.normal(ks[0], (1, HIDDEN), jnp.float32),
        "ln2_w": 1.0 + 0.1 * jax.random.normal(ks[1], (1, HIDDEN), jnp.float32),
        "wq": w(ks[2], (HIDDEN, QKV_DIM)),
        "wk": w(ks[3], (HIDDEN, QKV_DIM)),
        "wv": w(ks[4], (HIDDEN, QKV_DIM)),
        "wo": w(ks[5], (QKV_DIM, HIDDEN)),
        "wg": w(ks[6], (HIDDEN, INTERMEDIATE)),
        "wu": w(ks[7], (HIDDEN, INTERMEDIATE)),
        "wd": w(ks[8], (INTERMEDIATE, HIDDEN)),
    }


if __name__ == "__main__":
    key = jax.random.PRNGKey(0)
    k_param, k_x = jax.random.split(key)
    params = init_params(k_param)
    hidden_states = jax.random.normal(k_x, (BATCH, SEQ, HIDDEN), jnp.float32)

    # default: collapsed grid (single-TC v5e/v6e friendly)
    out, (k_cache, v_cache) = jax.block_until_ready(
        neuron_llama_decoder_layer(hidden_states, params)
    )

    ref_out, (ref_k, ref_v) = reference_decoder_layer(hidden_states, params)
    assert out.shape == (BATCH, SEQ, HIDDEN)
    assert k_cache.shape == (BATCH, NUM_HEADS, SEQ, HEAD_DIM)
    assert jnp.allclose(out, ref_out, rtol=2e-2, atol=2e-2)
    assert jnp.allclose(k_cache, ref_k, rtol=2e-2, atol=2e-2)
    assert jnp.allclose(v_cache, ref_v, rtol=2e-2, atol=2e-2)

    # v7x-style variant: batch grid with "parallel" semantics (2 TensorCores)
    out_p, (k_p, v_p) = jax.block_until_ready(
        neuron_llama_decoder_layer(hidden_states, params, batch_parallel=True)
    )
    assert jnp.allclose(out_p, ref_out, rtol=2e-2, atol=2e-2)
    assert jnp.allclose(k_p, ref_k, rtol=2e-2, atol=2e-2)
    assert jnp.allclose(v_p, ref_v, rtol=2e-2, atol=2e-2)

    print("KERNEL_OK")
</pallas_src>

<mosaic_0001>
module attributes {stable_mosaic.version = 11 : i64} {
  func.func @decoder_layer_kernel(%arg0: i32, %arg1: memref<16x32xf32, #tpu.memory_space<vmem>>, %arg2: memref<16x32xf32, #tpu.memory_space<vmem>>, %arg3: memref<16x32xf32, #tpu.memory_space<vmem>>, %arg4: memref<1x32xf32, #tpu.memory_space<vmem>>, %arg5: memref<1x32xf32, #tpu.memory_space<vmem>>, %arg6: memref<32x96xbf16, #tpu.memory_space<vmem>>, %arg7: memref<32x32xbf16, #tpu.memory_space<vmem>>, %arg8: memref<32x128xbf16, #tpu.memory_space<vmem>>, %arg9: memref<64x32xbf16, #tpu.memory_space<vmem>>, %arg10: memref<16x32xf32, #tpu.memory_space<vmem>>, %arg11: memref<16x32xf32, #tpu.memory_space<vmem>>, %arg12: memref<16x32xf32, #tpu.memory_space<vmem>>) attributes {dimension_semantics = [#tpu.dimension_semantics<arbitrary>], iteration_bounds = array<i64: 1>, scalar_prefetch = 0 : i64, scratch_operands = 0 : i64, tpu.core_type = #tpu.core_type<tc>, window_params = [{transform_indices = @transform_0, window_bounds = array<i64: 16, 32>}, {transform_indices = @transform_1, window_bounds = array<i64: 16, 32>}, {transform_indices = @transform_2, window_bounds = array<i64: 16, 32>}, {pipeline_mode = #tpu.pipeline_mode<synchronous>, transform_indices = @transform_3, window_bounds = array<i64: 1, 32>}, {pipeline_mode = #tpu.pipeline_mode<synchronous>, transform_indices = @transform_4, window_bounds = array<i64: 1, 32>}, {pipeline_mode = #tpu.pipeline_mode<synchronous>, transform_indices = @transform_5, window_bounds = array<i64: 32, 96>}, {pipeline_mode = #tpu.pipeline_mode<synchronous>, transform_indices = @transform_6, window_bounds = array<i64: 32, 32>}, {pipeline_mode = #tpu.pipeline_mode<synchronous>, transform_indices = @transform_7, window_bounds = array<i64: 32, 128>}, {pipeline_mode = #tpu.pipeline_mode<synchronous>, transform_indices = @transform_8, window_bounds = array<i64: 64, 32>}, {transform_indices = @transform_9, window_bounds = array<i64: 16, 32>}, {transform_indices = @transform_10, window_bounds = array<i64: 16, 32>}, {transform_indices = @transform_11, window_bounds = array<i64: 16, 32>}]} {
    %c0 = arith.constant 0 : index
    %c0_0 = arith.constant 0 : index
    %0 = vector.load %arg1[%c0, %c0_0] : memref<16x32xf32, #tpu.memory_space<vmem>>, vector<16x32xf32>
    %c0_1 = arith.constant 0 : index
    %c0_2 = arith.constant 0 : index
    %1 = vector.load %arg4[%c0_1, %c0_2] : memref<1x32xf32, #tpu.memory_space<vmem>>, vector<1x32xf32>
    %2 = arith.mulf %0, %0 : vector<16x32xf32>
    %cst = arith.constant dense<0.000000e+00> : vector<16xf32>
    %3 = vector.multi_reduction <add>, %2, %cst [1] : vector<16x32xf32> to vector<16xf32>
    %4 = vector.shape_cast %3 : vector<16xf32> to vector<16x1xf32>
    %cst_3 = arith.constant 3.200000e+01 : f32
    %5 = vector.broadcast %cst_3 : f32 to vector<16x1xf32>
    %6 = arith.divf %4, %5 : vector<16x1xf32>
    %cst_4 = arith.constant 9.99999997E-7 : f32
    %7 = vector.broadcast %cst_4 : f32 to vector<16x1xf32>
    %8 = arith.addf %6, %7 : vector<16x1xf32>
    %9 = math.rsqrt %8 : vector<16x1xf32>
    %10 = vector.broadcast %9 : vector<16x1xf32> to vector<16x32xf32>
    %11 = arith.mulf %0, %10 : vector<16x32xf32>
    %12 = vector.broadcast %1 : vector<1x32xf32> to vector<16x32xf32>
    %13 = arith.mulf %11, %12 : vector<16x32xf32>
    %14 = arith.truncf %13 : vector<16x32xf32> to vector<16x32xbf16>
    %c0_5 = arith.constant 0 : index
    %c0_6 = arith.constant 0 : index
    %15 = vector.load %arg6[%c0_5, %c0_6] : memref<32x96xbf16, #tpu.memory_space<vmem>>, vector<32x96xbf16>
    %cst_7 = arith.constant dense<0.000000e+00> : vector<16x96xf32>
    %16 = tpu.matmul %14, %15, %cst_7 {dimension_numbers = #tpu.dot_dimension_numbers<[1], [0], [0], [1], [0, 0, 1, 1], [], []>} : vector<16x32xbf16>, vector<32x96xbf16>, vector<16x96xf32> -> vector<16x96xf32>
    %17 = vector.extract_strided_slice %16 {offsets = [0, 0], sizes = [16, 32], strides = [1, 1]} : vector<16x96xf32> to vector<16x32xf32>
    %18 = vector.extract_strided_slice %16 {offsets = [0, 32], sizes = [16, 32], strides = [1, 1]} : vector<16x96xf32> to vector<16x32xf32>
    %19 = vector.extract_strided_slice %16 {offsets = [0, 64], sizes = [16, 32], strides = [1, 1]} : vector<16x96xf32> to vector<16x32xf32>
    %c0_8 = arith.constant 0 : index
    %c0_9 = arith.constant 0 : index
    %20 = vector.load %arg2[%c0_8, %c0_9] : memref<16x32xf32, #tpu.memory_space<vmem>>, vector<16x32xf32>
    %c0_10 = arith.constant 0 : index
    %c0_11 = arith.constant 0 : index
    %21 = vector.load %arg3[%c0_10, %c0_11] : memref<16x32xf32, #tpu.memory_space<vmem>>, vector<16x32xf32>
    %22 = tpu.iota {dimensions = array<i32: 1>} : vector<1x32xi32>
    %c7_i32 = arith.constant 7 : i32
    %23 = vector.broadcast %c7_i32 : i32 to vector<1x32xi32>
    %24 = arith.andi %22, %23 : vector<1x32xi32>
    %c4_i32 = arith.constant 4 : i32
    %25 = vector.broadcast %c4_i32 : i32 to vector<1x32xi32>
    %26 = arith.cmpi slt, %24, %25 : vector<1x32xi32>
    %27 = vector.extract_strided_slice %17 {offsets = [0, 4], sizes = [16, 28], strides = [1, 1]} : vector<16x32xf32> to vector<16x28xf32>
    %28 = vector.extract_strided_slice %17 {offsets = [0, 0], sizes = [16, 4], strides = [1, 1]} : vector<16x32xf32> to vector<16x4xf32>
    %29 = tpu.concatenate %27, %28 in 1 : vector<16x28xf32>, vector<16x4xf32> -> vector<16x32xf32>
    %30 = vector.extract_strided_slice %17 {offsets = [0, 28], sizes = [16, 4], strides = [1, 1]} : vector<16x32xf32> to vector<16x4xf32>
    %31 = vector.extract_strided_slice %17 {offsets = [0, 0], sizes = [16, 28], strides = [1, 1]} : vector<16x32xf32> to vector<16x28xf32>
    %32 = tpu.concatenate %30, %31 in 1 : vector<16x4xf32>, vector<16x28xf32> -> vector<16x32xf32>
    %33 = vector.shape_cast %26 : vector<1x32xi1> to vector<1x32xi1>
    %34 = vector.broadcast %33 : vector<1x32xi1> to vector<16x32xi1>
    %35 = arith.select %34, %29, %32 : vector<16x32xi1>, vector<16x32xf32>
    %36 = arith.mulf %17, %20 : vector<16x32xf32>
    %37 = arith.mulf %35, %21 : vector<16x32xf32>
    %38 = arith.addf %36, %37 : vector<16x32xf32>
    %39 = vector.extract_strided_slice %18 {offsets = [0, 4], sizes = [16, 28], strides = [1, 1]} : vector<16x32xf32> to vector<16x28xf32>
    %40 = vector.extract_strided_slice %18 {offsets = [0, 0], sizes = [16, 4], strides = [1, 1]} : vector<16x32xf32> to vector<16x4xf32>
    %41 = tpu.concatenate %39, %40 in 1 : vector<16x28xf32>, vector<16x4xf32> -> vector<16x32xf32>
    %42 = vector.extract_strided_slice %18 {offsets = [0, 28], sizes = [16, 4], strides = [1, 1]} : vector<16x32xf32> to vector<16x4xf32>
    %43 = vector.extract_strided_slice %18 {offsets = [0, 0], sizes = [16, 28], strides = [1, 1]} : vector<16x32xf32> to vector<16x28xf32>
    %44 = tpu.concatenate %42, %43 in 1 : vector<16x4xf32>, vector<16x28xf32> -> vector<16x32xf32>
    %45 = vector.shape_cast %26 : vector<1x32xi1> to vector<1x32xi1>
    %46 = vector.broadcast %45 : vector<1x32xi1> to vector<16x32xi1>
    %47 = arith.select %46, %41, %44 : vector<16x32xi1>, vector<16x32xf32>
    %48 = arith.mulf %18, %20 : vector<16x32xf32>
    %49 = arith.mulf %47, %21 : vector<16x32xf32>
    %50 = arith.addf %48, %49 : vector<16x32xf32>
    %c0_12 = arith.constant 0 : index
    %c0_13 = arith.constant 0 : index
    %51 = vector.load %arg11[%c0_12, %c0_13] : memref<16x32xf32, #tpu.memory_space<vmem>>, vector<16x32xf32>
    tpu.vector_store %arg11[%c0_12, %c0_13], %50 {strides = array<i32>} : memref<16x32xf32, #tpu.memory_space<vmem>>, vector<16x32xf32>,
    %c0_14 = arith.constant 0 : index
    %c0_15 = arith.constant 0 : index
    %52 = vector.load %arg12[%c0_14, %c0_15] : memref<16x32xf32, #tpu.memory_space<vmem>>, vector<16x32xf32>
    tpu.vector_store %arg12[%c0_14, %c0_15], %19 {strides = array<i32>} : memref<16x32xf32, #tpu.memory_space<vmem>>, vector<16x32xf32>,
    %53 = vector.extract_strided_slice %38 {offsets = [0, 0], sizes = [16, 8], strides = [1, 1]} : vector<16x32xf32> to vector<16x8xf32>
    %54 = vector.shape_cast %53 : vector<16x8xf32> to vector<2x8x8xf32>
    %55 = vector.extract_strided_slice %38 {offsets = [0, 8], sizes = [16, 8], strides = [1, 1]} : vector<16x32xf32> to vector<16x8xf32>
    %56 = vector.shape_cast %55 : vector<16x8xf32> to vector<2x8x8xf32>
    %57 = vector.extract_strided_slice %38 {offsets = [0, 16], sizes = [16, 8], strides = [1, 1]} : vector<16x32xf32> to vector<16x8xf32>
    %58 = vector.shape_cast %57 : vector<16x8xf32> to vector<2x8x8xf32>
    %59 = vector.extract_strided_slice %38 {offsets = [0, 24], sizes = [16, 8], strides = [1, 1]} : vector<16x32xf32> to vector<16x8xf32>
    %60 = vector.shape_cast %59 : vector<16x8xf32> to vector<2x8x8xf32>
    %61 = tpu.concatenate %54, %56, %58, %60 in 0 : vector<2x8x8xf32>, vector<2x8x8xf32>, vector<2x8x8xf32>, vector<2x8x8xf32> -> vector<8x8x8xf32>
    %62 = arith.truncf %61 : vector<8x8x8xf32> to vector<8x8x8xbf16>
    %63 = vector.extract_strided_slice %50 {offsets = [0, 0], sizes = [16, 8], strides = [1, 1]} : vector<16x32xf32> to vector<16x8xf32>
    %64 = vector.shape_cast %63 : vector<16x8xf32> to vector<2x8x8xf32>
    %65 = vector.extract_strided_slice %50 {offsets = [0, 8], sizes = [16, 8], strides = [1, 1]} : vector<16x32xf32> to vector<16x8xf32>
    %66 = vector.shape_cast %65 : vector<16x8xf32> to vector<2x8x8xf32>
    %67 = vector.extract_strided_slice %50 {offsets = [0, 16], sizes = [16, 8], strides = [1, 1]} : vector<16x32xf32> to vector<16x8xf32>
    %68 = vector.shape_cast %67 : vector<16x8xf32> to vector<2x8x8xf32>
    %69 = vector.extract_strided_slice %50 {offsets = [0, 24], sizes = [16, 8], strides = [1, 1]} : vector<16x32xf32> to vector<16x8xf32>
    %70 = vector.shape_cast %69 : vector<16x8xf32> to vector<2x8x8xf32>
    %71 = tpu.concatenate %64, %66, %68, %70 in 0 : vector<2x8x8xf32>, vector<2x8x8xf32>, vector<2x8x8xf32>, vector<2x8x8xf32> -> vector<8x8x8xf32>
    %72 = arith.truncf %71 : vector<8x8x8xf32> to vector<8x8x8xbf16>
    %73 = vector.extract_strided_slice %19 {offsets = [0, 0], sizes = [16, 8], strides = [1, 1]} : vector<16x32xf32> to vector<16x8xf32>
    %74 = vector.shape_cast %73 : vector<16x8xf32> to vector<2x8x8xf32>
    %75 = vector.extract_strided_slice %19 {offsets = [0, 8], sizes = [16, 8], strides = [1, 1]} : vector<16x32xf32> to vector<16x8xf32>
    %76 = vector.shape_cast %75 : vector<16x8xf32> to vector<2x8x8xf32>
    %77 = vector.extract_strided_slice %19 {offsets = [0, 16], sizes = [16, 8], strides = [1, 1]} : vector<16x32xf32> to vector<16x8xf32>
    %78 = vector.shape_cast %77 : vector<16x8xf32> to vector<2x8x8xf32>
    %79 = vector.extract_strided_slice %19 {offsets = [0, 24], sizes = [16, 8], strides = [1, 1]} : vector<16x32xf32> to vector<16x8xf32>
    %80 = vector.shape_cast %79 : vector<16x8xf32> to vector<2x8x8xf32>
    %81 = tpu.concatenate %74, %76, %78, %80 in 0 : vector<2x8x8xf32>, vector<2x8x8xf32>, vector<2x8x8xf32>, vector<2x8x8xf32> -> vector<8x8x8xf32>
    %82 = arith.truncf %81 : vector<8x8x8xf32> to vector<8x8x8xbf16>
    "tpu.trace_start"() <{level = 10 : i32, message = "bqd,bkd->bqk"}> : () -> ()
    %cst_16 = arith.constant dense<0.000000e+00> : vector<8x8x8xf32>
    %83 = tpu.matmul %62, %72, %cst_16 {dimension_numbers = #tpu.dot_dimension_numbers<[2], [2], [1], [1], [0, 0, 0, 1, 1, 1], [0], [0]>} : vector<8x8x8xbf16>, vector<8x8x8xbf16>, vector<8x8x8xf32> -> vector<8x8x8xf32>
    "tpu.trace_stop"() : () -> ()
    %84 = tpu.iota {dimensions = array<i32: 1>} : vector<8x8x8xi32>
    %85 = tpu.iota {dimensions = array<i32: 2>} : vector<8x8x8xi32>
    %86 = arith.cmpi sle, %85, %84 : vector<8x8x8xi32>
    %cst_17 = arith.constant -1.000000e+30 : f32
    %87 = vector.broadcast %cst_17 : f32 to vector<8x8x8xf32>
    %88 = arith.select %86, %83, %87 : vector<8x8x8xi1>, vector<8x8x8xf32>
    %cst_18 = arith.constant dense<0xFF800000> : vector<8x8xf32>
    %89 = vector.multi_reduction <maximumf>, %88, %cst_18 [2] : vector<8x8x8xf32> to vector<8x8xf32>
    %90 = vector.shape_cast %89 : vector<8x8xf32> to vector<8x8x1xf32>
    %91 = vector.broadcast %90 : vector<8x8x1xf32> to vector<8x8x8xf32>
    %92 = arith.subf %88, %91 : vector<8x8x8xf32>
    %93 = math.exp %92 : vector<8x8x8xf32>
    %cst_19 = arith.constant dense<0.000000e+00> : vector<8x8xf32>
    %94 = vector.multi_reduction <add>, %93, %cst_19 [2] : vector<8x8x8xf32> to vector<8x8xf32>
    %95 = vector.shape_cast %94 : vector<8x8xf32> to vector<8x8x1xf32>
    %96 = tpu.reciprocal %95 {approx = true} : vector<8x8x1xf32> -> vector<8x8x1xf32>
    %97 = vector.broadcast %96 : vector<8x8x1xf32> to vector<8x8x8xf32>
    %98 = arith.mulf %93, %97 : vector<8x8x8xf32>
    %99 = arith.truncf %98 : vector<8x8x8xf32> to vector<8x8x8xbf16>
    "tpu.trace_start"() <{level = 10 : i32, message = "bqk,bkd->bqd"}> : () -> ()
    %cst_20 = arith.constant dense<0.000000e+00> : vector<8x8x8xf32>
    %100 = tpu.matmul %99, %82, %cst_20 {dimension_numbers = #tpu.dot_dimension_numbers<[2], [1], [1], [2], [0, 0, 0, 1, 1, 2], [0], [0]>} : vector<8x8x8xbf16>, vector<8x8x8xbf16>, vector<8x8x8xf32> -> vector<8x8x8xf32>
    "tpu.trace_stop"() : () -> ()
    %101 = vector.extract_strided_slice %100 {offsets = [0, 0, 0], sizes = [2, 8, 8], strides = [1, 1, 1]} : vector<8x8x8xf32> to vector<2x8x8xf32>
    %102 = vector.shape_cast %101 : vector<2x8x8xf32> to vector<16x8xf32>
    %103 = vector.extract_strided_slice %100 {offsets = [2, 0, 0], sizes = [2, 8, 8], strides = [1, 1, 1]} : vector<8x8x8xf32> to vector<2x8x8xf32>
    %104 = vector.shape_cast %103 : vector<2x8x8xf32> to vector<16x8xf32>
    %105 = vector.extract_strided_slice %100 {offsets = [4, 0, 0], sizes = [2, 8, 8], strides = [1, 1, 1]} : vector<8x8x8xf32> to vector<2x8x8xf32>
    %106 = vector.shape_cast %105 : vector<2x8x8xf32> to vector<16x8xf32>
    %107 = vector.extract_strided_slice %100 {offsets = [6, 0, 0], sizes = [2, 8, 8], strides = [1, 1, 1]} : vector<8x8x8xf32> to vector<2x8x8xf32>
    %108 = vector.shape_cast %107 : vector<2x8x8xf32> to vector<16x8xf32>
    %109 = tpu.concatenate %102, %104, %106, %108 in 1 : vector<16x8xf32>, vector<16x8xf32>, vector<16x8xf32>, vector<16x8xf32> -> vector<16x32xf32>
    %110 = arith.truncf %109 : vector<16x32xf32> to vector<16x32xbf16>
    %c0_21 = arith.constant 0 : index
    %c0_22 = arith.constant 0 : index
    %111 = vector.load %arg7[%c0_21, %c0_22] : memref<32x32xbf16, #tpu.memory_space<vmem>>, vector<32x32xbf16>
    %cst_23 = arith.constant dense<0.000000e+00> : vector<16x32xf32>
    %112 = tpu.matmul %110, %111, %cst_23 {dimension_numbers = #tpu.dot_dimension_numbers<[1], [0], [0], [1], [0, 0, 1, 1], [], []>} : vector<16x32xbf16>, vector<32x32xbf16>, vector<16x32xf32> -> vector<16x32xf32>
    %113 = arith.addf %0, %112 : vector<16x32xf32>
    %c0_24 = arith.constant 0 : index
    %c0_25 = arith.constant 0 : index
    %114 = vector.load %arg5[%c0_24, %c0_25] : memref<1x32xf32, #tpu.memory_space<vmem>>, vector<1x32xf32>
    %115 = arith.mulf %113, %113 : vector<16x32xf32>
    %cst_26 = arith.constant dense<0.000000e+00> : vector<16xf32>
    %116 = vector.multi_reduction <add>, %115, %cst_26 [1] : vector<16x32xf32> to vector<16xf32>
    %117 = vector.shape_cast %116 : vector<16xf32> to vector<16x1xf32>
    %cst_27 = arith.constant 3.200000e+01 : f32
    %118 = vector.broadcast %cst_27 : f32 to vector<16x1xf32>
    %119 = arith.divf %117, %118 : vector<16x1xf32>
    %cst_28 = arith.constant 9.99999997E-7 : f32
    %120 = vector.broadcast %cst_28 : f32 to vector<16x1xf32>
    %121 = arith.addf %119, %120 : vector<16x1xf32>
    %122 = math.rsqrt %121 : vector<16x1xf32>
    %123 = vector.broadcast %122 : vector<16x1xf32> to vector<16x32xf32>
    %124 = arith.mulf %113, %123 : vector<16x32xf32>
    %125 = vector.broadcast %114 : vector<1x32xf32> to vector<16x32xf32>
    %126 = arith.mulf %124, %125 : vector<16x32xf32>
    %127 = arith.truncf %126 : vector<16x32xf32> to vector<16x32xbf16>
    %c0_29 = arith.constant 0 : index
    %c0_30 = arith.constant 0 : index
    %128 = vector.load %arg8[%c0_29, %c0_30] : memref<32x128xbf16, #tpu.memory_space<vmem>>, vector<32x128xbf16>
    %cst_31 = arith.constant dense<0.000000e+00> : vector<16x128xf32>
    %129 = tpu.matmul %127, %128, %cst_31 {dimension_numbers = #tpu.dot_dimension_numbers<[1], [0], [0], [1], [0, 0, 1, 1], [], []>} : vector<16x32xbf16>, vector<32x128xbf16>, vector<16x128xf32> -> vector<16x128xf32>
    %130 = vector.extract_strided_slice %129 {offsets = [0, 0], sizes = [16, 64], strides = [1, 1]} : vector<16x128xf32> to vector<16x64xf32>
    %131 = vector.extract_strided_slice %129 {offsets = [0, 64], sizes = [16, 64], strides = [1, 1]} : vector<16x128xf32> to vector<16x64xf32>
    %132 = arith.negf %130 : vector<16x64xf32>
    %133 = math.exp %132 : vector<16x64xf32>
    %cst_32 = arith.constant 1.000000e+00 : f32
    %134 = vector.broadcast %cst_32 : f32 to vector<16x64xf32>
    %135 = arith.addf %134, %133 : vector<16x64xf32>
    %136 = arith.divf %134, %135 : vector<16x64xf32>
    %137 = arith.mulf %130, %136 : vector<16x64xf32>
    %138 = arith.mulf %137, %131 : vector<16x64xf32>
    %139 = arith.truncf %138 : vector<16x64xf32> to vector<16x64xbf16>
    %c0_33 = arith.constant 0 : index
    %c0_34 = arith.constant 0 : index
    %140 = vector.load %arg9[%c0_33, %c0_34] : memref<64x32xbf16, #tpu.memory_space<vmem>>, vector<64x32xbf16>
    %cst_35 = arith.constant dense<0.000000e+00> : vector<16x32xf32>
    %141 = tpu.matmul %139, %140, %cst_35 {dimension_numbers = #tpu.dot_dimension_numbers<[1], [0], [0], [1], [0, 0, 1, 1], [], []>} : vector<16x64xbf16>, vector<64x32xbf16>, vector<16x32xf32> -> vector<16x32xf32>
    %142 = arith.addf %113, %141 : vector<16x32xf32>
    %c0_36 = arith.constant 0 : index
    %c0_37 = arith.constant 0 : index
    %143 = vector.load %arg10[%c0_36, %c0_37] : memref<16x32xf32, #tpu.memory_space<vmem>>, vector<16x32xf32>
    tpu.vector_store %arg10[%c0_36, %c0_37], %142 {strides = array<i32>} : memref<16x32xf32, #tpu.memory_space<vmem>>, vector<16x32xf32>,
    return
  }
  func.func @transform_0(%arg0: i32) -> (i32, i32) {
    %c0_i32 = arith.constant 0 : i32
    %c0_i32_0 = arith.constant 0 : i32
    return %arg0, %c0_i32 : i32, i32
  }
  func.func @transform_1(%arg0: i32) -> (i32, i32) {
    %c0_i32 = arith.constant 0 : i32
    %c0_i32_0 = arith.constant 0 : i32
    return %arg0, %c0_i32 : i32, i32
  }
  func.func @transform_2(%arg0: i32) -> (i32, i32) {
    %c0_i32 = arith.constant 0 : i32
    %c0_i32_0 = arith.constant 0 : i32
    return %arg0, %c0_i32 : i32, i32
  }
  func.func @transform_3(%arg0: i32) -> (i32, i32) {
    %c0_i32 = arith.constant 0 : i32
    %c0_i32_0 = arith.constant 0 : i32
    %c0_i32_1 = arith.constant 0 : i32
    return %c0_i32, %c0_i32_0 : i32, i32
  }
  func.func @transform_4(%arg0: i32) -> (i32, i32) {
    %c0_i32 = arith.constant 0 : i32
    %c0_i32_0 = arith.constant 0 : i32
    %c0_i32_1 = arith.constant 0 : i32
    return %c0_i32, %c0_i32_0 : i32, i32
  }
  func.func @transform_5(%arg0: i32) -> (i32, i32) {
    %c0_i32 = arith.constant 0 : i32
    %c0_i32_0 = arith.constant 0 : i32
    %c0_i32_1 = arith.constant 0 : i32
    return %c0_i32, %c0_i32_0 : i32, i32
  }
  func.func @transform_6(%arg0: i32) -> (i32, i32) {
    %c0_i32 = arith.constant 0 : i32
    %c0_i32_0 = arith.constant 0 : i32
    %c0_i32_1 = arith.constant 0 : i32
    return %c0_i32, %c0_i32_0 : i32, i32
  }
  func.func @transform_7(%arg0: i32) -> (i32, i32) {
    %c0_i32 = arith.constant 0 : i32
    %c0_i32_0 = arith.constant 0 : i32
    %c0_i32_1 = arith.constant 0 : i32
    return %c0_i32, %c0_i32_0 : i32, i32
  }
  func.func @transform_8(%arg0: i32) -> (i32, i32) {
    %c0_i32 = arith.constant 0 : i32
    %c0_i32_0 = arith.constant 0 : i32
    %c0_i32_1 = arith.constant 0 : i32
    return %c0_i32, %c0_i32_0 : i32, i32
  }
  func.func @transform_9(%arg0: i32) -> (i32, i32) {
    %c0_i32 = arith.constant 0 : i32
    %c0_i32_0 = arith.constant 0 : i32
    return %arg0, %c0_i32 : i32, i32
  }
  func.func @transform_10(%arg0: i32) -> (i32, i32) {
    %c0_i32 = arith.constant 0 : i32
    %c0_i32_0 = arith.constant 0 : i32
    return %arg0, %c0_i32 : i32, i32
  }
  func.func @transform_11(%arg0: i32) -> (i32, i32) {
    %c0_i32 = arith.constant 0 : i32
    %c0_i32_0 = arith.constant 0 : i32
    return %arg0, %c0_i32 : i32, i32
  }
}

</mosaic_0001>

<bundles_post_ra>
// kernel: tpu_custom_call.1
= control target key start
LH: loop header
LB: loop body
LE: loop exit
PB: predicated region body
PF: predicated region fallthrough
CT: control target
= control target key end

     0   :  { %17 = vsyncpa [#allocation3], 0  ;;  %s1902_s0 = inlined_call_operand.vmem [shape: f32[16,32], index: 0, kind: input, shape index: {}]   ;;  %s1903_s1 = inlined_call_operand.vmem [shape: f32[16,32], index: 1, kind: input, shape index: {}]   ;;  %s1904_s2 = inlined_call_operand.vmem [shape: f32[16,32], index: 2, kind: input, shape index: {}]   ;;  %s1905_s3 = inlined_call_operand.vmem [shape: f32[1,32], index: 3, kind: input, shape index: {}]   ;;  %s1906_s4 = inlined_call_operand.vmem [shape: f32[1,32], index: 4, kind: input, shape index: {}]   ;;  %s1907_s5 = inlined_call_operand.hbm [shape: bf16[32,96], index: 5, kind: input, shape index: {}]   ;;  %s1908_s6 = inlined_call_operand.hbm [shape: bf16[32,32], index: 6, kind: input, shape index: {}]   ;;  %s1909_s7 = inlined_call_operand.hbm [shape: bf16[32,128], index: 7, kind: input, shape index: {}]   ;;  %s1910_s8 = inlined_call_operand.vmem [shape: bf16[64,32], index: 8, kind: input, shape index: {}]   ;;  %s1911_s9 = inlined_call_operand.hbm [shape: f32[16,32], index: 9, kind: output, shape index: {0}]   ;;  %s1912_s10 = inlined_call_operand.hbm [shape: f32[16,32], index: 10, kind: output, shape index: {1}]   ;;  %s1913_s11 = inlined_call_operand.hbm [shape: f32[16,32], index: 11, kind: output, shape index: {2}]  }
   0x1   :  { %18 = vsyncpa [#allocation6], 0 }
   0x2   :  { %19 = vsyncpa [#allocation4], 0 }
   0x3   :  { %20 = vsyncpa [#allocation10], 0  ;;  %s48_s19 = sshll.u32 %s1908_s6, 4  ;;  %s1481_s20 = smov [#allocation5]   ;;  %s49_s19 = int_to_ptr.hbm [resolvable:$true] %s48_s19 }
   0x4   :  { %s50_s21 = sshll.u32 %s1481_s20, 4  ;;  %s35_s24 = sshll.u32 %s1907_s5, 4  ;;  %s51_s21 = int_to_ptr.vmem [resolvable:$true] %s50_s21  ;;  %s36_s24 = int_to_ptr.hbm [resolvable:$true] %s35_s24 }
   0x5   :  { %s1482_s25 = smov 64   ;;  %s1483_s26 = smov 4  }
   0x6   :  { %56 = dma.hbm_to_vmem [thread:$0]  %s49_s19, 256, %s51_s21, [#allocation6], %s1482_s25, %s1482_s25, %s1483_s26  }
   0x7   :  { %s1484_s27 = smov [#allocation2]   ;;  %s61_s6 = sshll.u32 %s1909_s7, 4  ;;  %s62_s6 = int_to_ptr.hbm [resolvable:$true] %s61_s6 }
   0x8   :  { %s37_s28 = sshll.u32 %s1484_s27, 4  ;;  %s1485_s5 = smov [#allocation7]   ;;  %s38_s28 = int_to_ptr.vmem [resolvable:$true] %s37_s28 }
   0x9   :  { %43 = dma.hbm_to_vmem [thread:$0]  %s36_s24, 256, %s38_s28, [#allocation3], %s1482_s25, %s1482_s25, %s1483_s26  }
   0xa   :  { %s63_s12 = sshll.u32 %s1485_s5, 4  ;;  %s64_s12 = int_to_ptr.vmem [resolvable:$true] %s63_s12 }
   0xb   :  { %69 = dma.hbm_to_vmem [thread:$0]  %s62_s6, 256, %s64_s12, [#allocation6], %s1482_s25, %s1482_s25, %s1483_s26  }
   0xc   :  { %1473 = dma.done.wait [#allocation3], 256  }
   0xd   :  { %1474 = vsyncadd [#allocation3], 4294967040 }
   0xe   :  { %1475 = dma.done.wait [#allocation6], 512  }
   0xf   :  { %1476 = vsyncadd [#allocation6], 4294966784  ;;  %v1585_v0 = vld [vmem:[%s1902_s0] sm:$0xff]  ;;  %vm90_vm0 = vcmask 261120   ;;  %v1592_v2 = vld [vmem:[%s1902_s0 + $0x8] sm:$0xff]  ;;  %v1486_v6 = vmov 32.0   ;;  %v173_v45 = vlaneseq }
  0x10   :  { %v88_v1 = vmul.f32 %v1585_v0, %v1585_v0  ;;  %v89_v4 = vmul.f32 %v1592_v2, %v1592_v2  ;;  %1279 = vrcp.f32 %v1486_v6  ;;  %v1215_v12 = vld [vmem:[#allocation2 + $0x8] sm:$0xff]  ;;  %v1214_v14 = vld [vmem:[#allocation2] sm:$0xff]  ;;  %s1487_s17 = smov 92   ;;  %s1488_s18 = smov 124   ;;  %vm191_vm9 = vcmask 228352  }
  0x11   :  { %161 = vmatpush.bf16.msra.mxu0 %v1215_v12  ;;  %v1277_v35 = vld [vmem:[%s1905_s3] ss:$0 sm:$0xff]  ;;  %s1489_s19 = smov 68   ;;  %s1490_s3 = smov 100   ;;  %v1627_v44 = vld [vmem:[%s1903_s1 + $0x8] sm:$0xff]  ;;  %v174_v46 = vand.u32 127, %v173_v45 }
  0x12   :  { %v91_v3 = vsel %vm90_vm0, %v88_v1, 0.0  ;;  %v94_v5 = vsel %vm90_vm0, %v89_v4, 0.0  ;;  %v169_v43 = vld [vmem:[%s1903_s1] sm:$0xff]  ;;  %s1491_s22 = smov 32   ;;  %s1492_s27 = smov 28   ;;  %v551_v47 = vshrl.u32 %v173_v45, 7 }
  0x13   :  { %92 = vadd.xlane.f32.xlu0 %v91_v3  ;;  %v175_v51 = vand.u32 7, %v174_v46  ;;  %vm206_vm10 = vcmask 31744   ;;  %v171_v55 = vld [vmem:[%s1904_s2] sm:$0xff]  ;;  %v1656_v1 = vld [vmem:[%s1904_s2 + $0x8] sm:$0xff]  ;;  %s1493_s2 = smov 120   ;;  %s1494_s6 = smov 104  }
  0x14   :  { %vm1633_vm8 = vcmp.le.s32.totalorder %v174_v46, %v551_v47  ;;  %s1495_s5 = smov 112   ;;  %s1496_s12 = smov 96   ;;  %vm362_vm12 = vcmask 64512   ;;  %vm665_vm13 = vcmask 1043456   ;;  %vm876_vm14 = vcmask 130048  }
  0x15   :  { %162 = vmatpush.bf16.msra.mxu0 %v1214_v14  ;;  %vm1637_vm11 = vcmp.lt.s32.totalorder %v175_v51, 4  ;;  %s1498_s13 = smov 16   ;;  %s1499_s14 = smov 24   ;;  %vm879_vm15 = vcmask 195584  }
  0x16   :  { %v1280_v7 = vpop.eup %1279  ;;  %s1116_s23 = sshll.u32 %s1912_s10, 4  ;;  %s1501_s24 = smov 128   ;;  %s1117_s23 = int_to_ptr.hbm [resolvable:$true] %s1116_s23 }
  0x17   :  { %v98_v8 = vmul.f32 32.0, %v1280_v7  ;;  %vm102_vm1 = vweird.f32 %v1280_v7  ;;  %s1129_s28 = sshll.u32 %s1913_s11, 4  ;;  %s1502_s29 = smov [#allocation11]   ;;  %s1130_s28 = int_to_ptr.hbm [resolvable:$true] %s1129_s28 }
  0x18   :  { %s1127_s30 = sshll.u32 %s1502_s29, 4  ;;  %s1503_s10 = smov [#allocation8]   ;;  %s1128_s30 = int_to_ptr.vmem [resolvable:$true] %s1127_s30 }
  0x19   :  { %v99_v9 = vsub.f32 1.0, %v98_v8 }
  0x1b   :  { %95 = vadd.xlane.f32.xlu0 %v94_v5  ;;  %v100_v10 = vmul.f32 %v1280_v7, %v99_v9 }
  0x1d   :  { %v101_v11 = vadd.f32 %v1280_v7, %v100_v10 }
  0x1f   :  { %v1598_v13 = vsel %vm102_vm1, %v1280_v7, %v101_v11 }
  0x86   :  { %v93_v15 = vpop.xlane.xlu0 %92 }
  0x87   :  { %v104_v16 = vmul.f32 %v1598_v13, %v93_v15 }
  0x89   :  { %v106_v17 = vadd.f32 1e-06, %v104_v16 }
  0x8b   :  { %1281 = vrsqrt.f32 %v106_v17  ;;  %vm114_vm3 = vweird.f32 %v106_v17 }
  0x8e   :  { %v96_v18 = vpop.xlane.xlu0 %95 }
  0x8f   :  { %v105_v19 = vmul.f32 %v1598_v13, %v96_v18 }
  0x91   :  { %v1282_v20 = vpop.eup %1281  ;;  %v107_v21 = vadd.f32 1e-06, %v105_v19 }
  0x92   :  { %v109_v22 = vmul.f32 %v1282_v20, %v106_v17  ;;  %vm115_vm2 = vweird.f32 %v1282_v20 }
  0x93   :  { %1283 = vrsqrt.f32 %v107_v21  ;;  %vm116_vm4 = vmor %vm114_vm3, %vm115_vm2  ;;  %vm124_vm6 = vweird.f32 %v107_v21 }
  0x94   :  { %v110_v23 = vmul.f32 %v1282_v20, %v109_v22 }
  0x96   :  { %v111_v24 = vmul.f32 0.5, %v110_v23 }
  0x98   :  { %v112_v25 = vsub.f32 1.5, %v111_v24 }
  0x99   :  { %v1284_v26 = vpop.eup %1283 }
  0x9a   :  { %v119_v27 = vmul.f32 %v1284_v26, %v107_v21  ;;  %v113_v28 = vmul.f32 %v1282_v20, %v112_v25  ;;  %vm125_vm5 = vweird.f32 %v1284_v26 }
  0x9b   :  { %vm126_vm7 = vmor %vm124_vm6, %vm125_vm5 }
  0x9c   :  { %v120_v29 = vmul.f32 %v1284_v26, %v119_v27  ;;  %v117_v31 = vsel %vm116_vm4, %v1282_v20, %v113_v28 }
  0x9d   :  { %v128_v34 = vmul.f32 %v117_v31, %v1585_v0 }
  0x9e   :  { %v121_v30 = vmul.f32 0.5, %v120_v29 }
  0x9f   :  { %v133_v38 = vmul.f32 %v1277_v35, %v128_v34 }
  0xa0   :  { %v122_v32 = vsub.f32 1.5, %v121_v30 }
  0xa2   :  { %v123_v33 = vmul.f32 %v1284_v26, %v122_v32 }
  0xa4   :  { %v127_v36 = vsel %vm126_vm7, %v1284_v26, %v123_v33 }
  0xa5   :  { %v129_v37 = vmul.f32 %v127_v36, %v1592_v2 }
  0xa7   :  { %v134_v39 = vmul.f32 %v1277_v35, %v129_v37 }
  0xa9   :  { %v135_v40 = vpack.c.bf16 %v134_v39, %v133_v38 }
  0xab   :  { %1160 = vmatmul.msk.bf16.vlgmr.msra.gmra.mxu0 %vm90_vm0, %v135_v40 }
 0x128   :  { %v1608_v41 = vpop.f32.mrf.mxu0 }
 0x129   :  { %219 = vrot.lane.b32.xlu2 %v1608_v41, %s1487_s17  ;;  %179 = vrot.lane.b32.xlu1 %v1608_v41, %s1488_s18  ;;  %v213_v22 = vmul.f32 %v169_v43, %v1608_v41 }
 0x130   :  { %v1612_v42 = vpop.f32.mrf.mxu0 }
 0x131   :  { %227 = vrot.lane.b32.xlu2 %v1608_v41, %s1489_s19  ;;  %194 = vrot.lane.b32.xlu1 %v1608_v41, %s1490_s3 }
 0x132   :  { %181 = vrot.lane.b32.xlu0 %v1612_v42, %s1488_s18 }
 0x139   :  { %221 = vrot.lane.b32.xlu2 %v1612_v42, %s1487_s17  ;;  %196 = vrot.lane.b32.xlu1 %v1612_v42, %s1490_s3 }
 0x141   :  { %239 = vrot.lane.b32.xlu2 %v169_v43, %s1491_s22  ;;  %229 = vrot.lane.b32.xlu1 %v1612_v42, %s1489_s19 }
 0x149   :  { %241 = vrot.lane.b32.xlu2 %v1627_v44, %s1491_s22 }
 0x151   :  { %185 = vrot.lane.b32.xlu2 %v1608_v41, %s1492_s27 }
 0x183   :  { %v220_v49 = vpop.permute.xlu2 %219 }
 0x18b   :  { %v228_v53 = vpop.permute.xlu2 %227 }
 0x193   :  { %v222_v62 = vpop.permute.xlu2 %221 }
 0x19b   :  { %v180_v50 = vpop.permute.xlu1 %179  ;;  %v240_v7 = vpop.permute.xlu2 %239 }
 0x19c   :  { %v225_v56 = vsel %vm191_vm9, %v220_v49, %v180_v50  ;;  %v245_v8 = vmul.f32 %v240_v7, %v1608_v41  ;;  %v1257_v7 = vpack.i.bf16 %v1612_v42, %v1608_v41 }
 0x1a3   :  { %v195_v54 = vpop.permute.xlu1 %194  ;;  %v242_v11 = vpop.permute.xlu2 %241 }
 0x1a4   :  { %v233_v57 = vsel %vm206_vm10, %v228_v53, %v195_v54  ;;  %v1651_v61 = vpop.permute.xlu0 %181  ;;  %v246_v12 = vmul.f32 %v242_v11, %v1612_v42  ;;  %v350_v11 = vpack.c.bf16 %v1612_v42, %v1612_v42 }
 0x1a5   :  { %v235_v58 = vsel %vm1637_vm11, %v225_v56, %v233_v57  ;;  %v226_v3 = vsel %vm191_vm9, %v222_v62, %v1651_v61 }
 0x1a6   :  { %v247_v59 = vmul.f32 %v235_v58, %v171_v55 }
 0x1a8   :  { %251 = vrot.lane.b32.xlu1 %v247_v59, %s1491_s22 }
 0x1ab   :  { %v1649_v60 = vpop.permute.xlu1 %196  ;;  %v186_v16 = vpop.permute.xlu2 %185 }
 0x1ac   :  { %v192_v18 = vsel %vm191_vm9, %v180_v50, %v186_v16  ;;  %v1252_v16 = vpack.i.bf16 %v1608_v41, %v1612_v42 }
 0x1b3   :  { %v230_v63 = vpop.permute.xlu1 %229 }
 0x1b4   :  { %v234_v4 = vsel %vm206_vm10, %v230_v63, %v1649_v60 }
 0x1b5   :  { %v236_v5 = vsel %vm1637_vm11, %v226_v3, %v234_v4  ;;  %v214_v3 = vmul.f32 %v1627_v44, %v1612_v42 }
 0x1b6   :  { %v248_v6 = vmul.f32 %v236_v5, %v1656_v1 }
 0x1b8   :  { %253 = vrot.lane.b32.xlu0 %v248_v6, %s1491_s22 }
 0x1c0   :  { %200 = vrot.lane.b32.xlu0 %v1608_v41, %s1483_s26 }
 0x21a   :  { %v252_v9 = vpop.permute.xlu1 %251 }
 0x21b   :  { %v1669_v10 = vadd.f32 %v252_v9, %v245_v8 }
 0x21d   :  { %305 = vrot.lane.b32.xlu1 %v1669_v10, %s1493_s2  ;;  %317 = vrot.lane.b32.xlu0 %v1669_v10, %s1494_s6  ;;  %v323_v27 = vpack.c.bf16 %v1669_v10, %v1669_v10 }
 0x21f   :  { %v358_v28 = vunpack.c.l.b16 %v323_v27 }
 0x221   :  { %v359_v29 = vpack.c.b16 %v358_v28, %v358_v28 }
 0x225   :  { %311 = vrot.lane.b32.xlu0 %v1669_v10, %s1495_s5 }
 0x22a   :  { %v254_v14 = vpop.permute.xlu0 %253 }
 0x22b   :  { %v1678_v15 = vadd.f32 %v254_v14, %v246_v12  ;;  %v683_v12 = vunpack.c.l.b16 %v350_v11 }
 0x22d   :  { %313 = vrot.lane.b32.xlu2 %v1678_v15, %s1495_s5  ;;  %307 = vrot.lane.b32.xlu1 %v1678_v15, %s1493_s2  ;;  %v324_v20 = vpack.c.bf16 %v1678_v15, %v1678_v15  ;;  %v684_v14 = vpack.c.b16 %v683_v12, %v683_v12 }
 0x22f   :  { %v383_v25 = vunpack.c.l.b16 %v324_v20 }
 0x231   :  { %v384_v26 = vpack.c.b16 %v383_v25, %v383_v25 }
 0x232   :  { %v201_v17 = vpop.permute.xlu0 %200 }
 0x233   :  { %v207_v19 = vsel %vm206_vm10, %v195_v54, %v201_v17 }
 0x234   :  { %v211_v21 = vsel %vm1637_vm11, %v192_v18, %v207_v19 }
 0x235   :  { %v215_v23 = vmul.f32 %v211_v21, %v171_v55  ;;  %202 = vrot.lane.b32.xlu2 %v1612_v42, %s1483_s26  ;;  %187 = vrot.lane.b32.xlu1 %v1612_v42, %s1492_s27  ;;  %s1497_s26 = smov 8  }
 0x237   :  { %v217_v24 = vadd.f32 %v215_v23, %v213_v22 }
 0x239   :  { %v297_v56 = vpack.c.bf16 %v217_v24, %v217_v24 }
 0x23d   :  { %319 = vrot.lane.b32.xlu1 %v1678_v15, %s1494_s6  ;;  %385 = vrot.lane.b32.xlu2 %v384_v26, %s1496_s12 }
 0x245   :  { %360 = vrot.lane.b32.xlu2 %v359_v29, %s1496_s12  ;;  %279 = vrot.lane.b32.xlu1 %v217_v24, %s1493_s2 }
 0x287   :  { %v314_v30 = vpop.permute.xlu2 %313 }
 0x288   :  { %v328_v31 = vpack.c.bf16 %v314_v30, %v314_v30 }
 0x28a   :  { %v479_v32 = vunpack.c.l.b16 %v328_v31 }
 0x28c   :  { %v480_v33 = vpack.c.b16 %v479_v32, %v479_v32 }
 0x28e   :  { %481 = vrot.lane.b32.xlu1 %v480_v33, %s1496_s12 }
 0x28f   :  { %v306_v34 = vpop.permute.xlu1 %305  ;;  %v203_v35 = vpop.permute.xlu2 %202 }
 0x290   :  { %v325_v36 = vpack.c.bf16 %v306_v34, %v306_v34  ;;  %v318_v37 = vpop.permute.xlu0 %317  ;;  %v208_v58 = vsel %vm206_vm10, %v1649_v60, %v203_v35 }
 0x291   :  { %v329_v38 = vpack.c.bf16 %v318_v37, %v318_v37 }
 0x292   :  { %v407_v39 = vunpack.c.l.b16 %v325_v36 }
 0x293   :  { %v503_v40 = vunpack.c.l.b16 %v329_v38 }
 0x294   :  { %v408_v43 = vpack.c.b16 %v407_v39, %v407_v39 }
 0x295   :  { %v504_v45 = vpack.c.b16 %v503_v40, %v503_v40 }
 0x296   :  { %409 = vrot.lane.b32.xlu0 %v408_v43, %s1496_s12 }
 0x297   :  { %505 = vrot.lane.b32.xlu2 %v504_v45, %s1496_s12  ;;  %v386_v46 = vpop.permute.xlu2 %385 }
 0x298   :  { %v391_v47 = vsel %vm362_vm12, %v386_v46, 0  ;;  %v312_v62 = vpop.permute.xlu0 %311 }
 0x299   :  { %400 = vmatpush.bf16.xpose.msra.mxu2 %v391_v47  ;;  %v327_v5 = vpack.c.bf16 %v312_v62, %v312_v62 }
 0x29b   :  { %v455_v52 = vunpack.c.l.b16 %v327_v5 }
 0x29d   :  { %v456_v9 = vpack.c.b16 %v455_v52, %v455_v52 }
 0x29f   :  { %291 = vrot.lane.b32.xlu2 %v217_v24, %s1494_s6  ;;  %v308_v49 = vpop.permute.xlu1 %307  ;;  %v361_v50 = vpop.permute.xlu2 %360 }
 0x2a0   :  { %v326_v51 = vpack.c.bf16 %v308_v49, %v308_v49  ;;  %v367_v53 = vsel %vm362_vm12, %v361_v50, 0 }
 0x2a1   :  { %376 = vmatpush.bf16.xpose.msra.mxu1 %v367_v53 }
 0x2a2   :  { %v431_v54 = vunpack.c.l.b16 %v326_v51 }
 0x2a4   :  { %v432_v55 = vpack.c.b16 %v431_v54, %v431_v54 }
 0x2a6   :  { %433 = vrot.lane.b32.xlu0 %v432_v55, %s1496_s12 }
 0x2a7   :  { %285 = vrot.lane.b32.xlu2 %v217_v24, %s1495_s5  ;;  %v188_v57 = vpop.permute.xlu1 %187 }
 0x2a8   :  { %v193_v59 = vsel %vm191_vm9, %v1651_v61, %v188_v57  ;;  %1161 = vmatmul.msk.bf16.vlgmr.msra.gmra.mxu1 %vm362_vm12, %v297_v56 }
 0x2a9   :  { %v212_v63 = vsel %vm1637_vm11, %v193_v59, %v208_v58 }
 0x2aa   :  { %v216_v4 = vmul.f32 %v212_v63, %v1656_v1 }
 0x2ac   :  { %v218_v6 = vadd.f32 %v216_v4, %v214_v3 }
 0x2ae   :  { %287 = vrot.lane.b32.xlu1 %v218_v6, %s1495_s5  ;;  %281 = vrot.lane.b32.xlu0 %v218_v6, %s1493_s2  ;;  %v298_v60 = vpack.c.bf16 %v218_v6, %v218_v6 }
 0x2af   :  { %1258 = vrot.lane.b32.xlu2 %v1257_v7, %s1494_s6  ;;  %v320_v61 = vpop.permute.xlu1 %319 }
 0x2b0   :  { %v330_v8 = vpack.c.bf16 %v320_v61, %v320_v61  ;;  %1162 = vmatmul.msk.bf16.vlgmr.msra.gmra.mxu2 %vm362_vm12, %v298_v60 }
 0x2b2   :  { %v527_v44 = vunpack.c.l.b16 %v330_v8 }
 0x2b4   :  { %v528_v1 = vpack.c.b16 %v527_v44, %v527_v44 }
 0x2b6   :  { %529 = vrot.lane.b32.xlu1 %v528_v1, %s1496_s12  ;;  %457 = vrot.lane.b32.xlu0 %v456_v9, %s1496_s12 }
 0x2b7   :  { %v280_v17 = vpop.permute.xlu1 %279 }
 0x2b8   :  { %v299_v24 = vpack.c.bf16 %v280_v17, %v280_v17 }
 0x2be   :  { %1248 = vrot.lane.b32.xlu1 %v1257_v7, %s1493_s2  ;;  %293 = vrot.lane.b32.xlu0 %v218_v6, %s1494_s6  ;;  %s1101_s2 = sshll.u32 %s1503_s10, 4  ;;  %s1102_s2 = int_to_ptr.vmem [resolvable:$true] %s1101_s2 }
 0x2c6   :  { %685 = vrot.lane.b32.xlu1 %v684_v14, %s1482_s25  ;;  %1253 = vrot.lane.b32.xlu0 %v1252_v16, %s1495_s5 }
 0x2f1   :  { %v506_v20 = vpop.permute.xlu2 %505 }
 0x2f2   :  { %v511_v23 = vsel %vm362_vm12, %v506_v20, 0 }
 0x2f9   :  { %v292_v27 = vpop.permute.xlu2 %291 }
 0x2fa   :  { %v303_v28 = vpack.c.bf16 %v292_v27, %v292_v27 }
 0x300   :  { %v482_v18 = vpop.permute.xlu1 %481 }
 0x301   :  { %v487_v19 = vsel %vm362_vm12, %v482_v18, 0  ;;  %v286_v38 = vpop.permute.xlu2 %285 }
 0x302   :  { %496 = vmatpush.bf16.xpose.msrb.mxu2 %v487_v19  ;;  %v301_v40 = vpack.c.bf16 %v286_v38, %v286_v38 }
 0x308   :  { %v410_v21 = vpop.permute.xlu0 %409 }
 0x309   :  { %v415_v22 = vsel %vm362_vm12, %v410_v21, 0 }
 0x30a   :  { %424 = vmatpush.bf16.xpose.msra.mxu3 %v415_v22 }
 0x311   :  { %1163 = vmatmul.msk.bf16.vlgmr.msra.gmra.mxu3 %vm362_vm12, %v299_v24 }
 0x312   :  { %520 = vmatpush.bf16.xpose.msrb.mxu3 %v511_v23 }
 0x318   :  { %v434_v25 = vpop.permute.xlu0 %433 }
 0x319   :  { %v439_v26 = vsel %vm362_vm12, %v434_v25, 0 }
 0x31a   :  { %448 = vmatpush.bf16.xpose.msrb.mxu0 %v439_v26 }
 0x320   :  { %v288_v29 = vpop.permute.xlu1 %287  ;;  %v282_v30 = vpop.permute.xlu0 %281 }
 0x321   :  { %v302_v31 = vpack.c.bf16 %v288_v29, %v288_v29  ;;  %v300_v32 = vpack.c.bf16 %v282_v30, %v282_v30  ;;  %1167 = vmatmul.msk.bf16.vlgmr.msrb.gmra.mxu3 %vm362_vm12, %v303_v28 }
 0x323   :  { %1164 = vmatmul.msk.bf16.vlgmr.msrb.gmra.mxu0 %vm362_vm12, %v300_v32  ;;  %1166 = vmatmul.msk.bf16.vlgmr.msrb.gmra.mxu2 %vm362_vm12, %v302_v31 }
 0x325   :  { %v378_v33 = vpop.f32.mrf.mxu1 }
 0x326   :  { %v553_v4 = vsel %vm1633_vm8, %v378_v33, -1e+30 }
 0x327   :  { %v561_v5 = vsel %vm362_vm12, %v553_v4, -inf }
 0x328   :  { %v530_v34 = vpop.permute.xlu1 %529  ;;  %v458_v35 = vpop.permute.xlu0 %457 }
 0x329   :  { %v535_v36 = vsel %vm362_vm12, %v530_v34, 0  ;;  %v463_v37 = vsel %vm362_vm12, %v458_v35, 0 }
 0x32a   :  { %472 = vmatpush.bf16.xpose.msrb.mxu1 %v463_v37  ;;  %544 = vmatpush.bf16.xpose.msra.mxu0 %v535_v36 }
 0x32d   :  { %v380_v39 = vpop.f32.mrf.mxu1 }
 0x330   :  { %v1249_v43 = vpop.permute.xlu1 %1248  ;;  %v294_v45 = vpop.permute.xlu0 %293 }
 0x331   :  { %v1250_v46 = vunpack.i.l.bf16 %v1249_v43  ;;  %v304_v47 = vpack.c.bf16 %v294_v45, %v294_v45  ;;  %1165 = vmatmul.msk.bf16.vlgmr.msrb.gmra.mxu1 %vm362_vm12, %v301_v40  ;;  %v1251_v59 = vunpack.i.h.bf16 %v1249_v43 }
 0x333   :  { %v351_v49 = vpack.c.bf16 %v1250_v46, %v1250_v46  ;;  %v402_v50 = vpop.f32.mrf.mxu2  ;;  %1168 = vmatmul.msk.bf16.vlgmr.msra.gmra.mxu0 %vm362_vm12, %v304_v47  ;;  %v352_v62 = vpack.c.bf16 %v1251_v59, %v1251_v59  ;;  %v349_v46 = vpack.c.bf16 %v1608_v41, %v1608_v41  ;;  %v1786_v47 = vpop.permute.xlu2 %1258 }
 0x334   :  { %v554_v51 = vsel %vm1633_vm8, %v402_v50, -1e+30 }
 0x335   :  { %v564_v53 = vsel %vm362_vm12, %v554_v51, -inf  ;;  %v707_v54 = vunpack.c.l.b16 %v351_v49  ;;  %v731_v63 = vunpack.c.l.b16 %v352_v62  ;;  %v658_v49 = vunpack.c.l.b16 %v349_v46 }
 0x336   :  { %565 = vmax.xlane.f32.xlu1 %v564_v53 }
 0x337   :  { %v708_v55 = vpack.c.b16 %v707_v54, %v707_v54  ;;  %v732_v3 = vpack.c.b16 %v731_v63, %v731_v63  ;;  %v659_v50 = vpack.c.b16 %v658_v49, %v658_v49 }
 0x338   :  { %v686_v56 = vpop.permute.xlu1 %685  ;;  %v1763_v9 = vpop.permute.xlu0 %1253 }
 0x339   :  { %v691_v57 = vsel %vm665_vm13, %v686_v56, 0  ;;  %709 = vrot.lane.b32.xlu0 %v708_v55, %s1482_s25 }
 0x33a   :  { %700 = vmatpush.bf16.msra.mxu2 %v691_v57 }
 0x33b   :  { %v404_v58 = vpop.f32.mrf.mxu2 }
 0x34f   :  { %733 = vrot.lane.b32.xlu1 %v732_v3, %s1482_s25 }
 0x363   :  { %562 = vmax.xlane.f32.xlu0 %v561_v5 }
 0x394   :  { %v426_v6 = vpop.f32.mrf.mxu3 }
 0x395   :  { %v555_v7 = vsel %vm1633_vm8, %v426_v6, -1e+30 }
 0x396   :  { %v567_v60 = vsel %vm362_vm12, %v555_v7, -inf }
 0x397   :  { %568 = vmax.xlane.f32.xlu2 %v567_v60 }
 0x39c   :  { %v428_v61 = vpop.f32.mrf.mxu3 }
 0x3a0   :  { %v450_v52 = vpop.f32.mrf.mxu0 }
 0x3a1   :  { %v556_v8 = vsel %vm1633_vm8, %v450_v52, -1e+30 }
 0x3a2   :  { %v570_v44 = vsel %vm362_vm12, %v556_v8, -inf }
 0x3a3   :  { %571 = vmax.xlane.f32.xlu2 %v570_v44 }
 0x3a4   :  { %v522_v1 = vpop.f32.mrf.mxu3 }
 0x3a5   :  { %v559_v39 = vsel %vm1633_vm8, %v522_v1, -1e+30 }
 0x3a6   :  { %v498_v11 = vpop.f32.mrf.mxu2  ;;  %v579_v40 = vsel %vm362_vm12, %v559_v39, -inf }
 0x3a7   :  { %v558_v27 = vsel %vm1633_vm8, %v498_v11, -1e+30 }
 0x3a8   :  { %v452_v12 = vpop.f32.mrf.mxu0  ;;  %v576_v31 = vsel %vm362_vm12, %v558_v27, -inf }
 0x3a9   :  { %v566_v14 = vpop.xlane.xlu1 %565 }
 0x3aa   :  { %v586_v16 = vsub.f32 %v554_v51, %v566_v14  ;;  %v1256_v14 = vunpack.i.h.bf16 %v1763_v9 }
 0x3ab   :  { %v710_v17 = vpop.permute.xlu0 %709 }
 0x3ac   :  { %v595_v18 = vmul.f32 1.442695, %v586_v16  ;;  %v715_v19 = vsel %vm665_vm13, %v710_v17, 0  ;;  %v524_v20 = vpop.f32.mrf.mxu3  ;;  %v1260_v16 = vunpack.i.l.bf16 %v1786_v47  ;;  %v353_v17 = vpack.c.bf16 %v1256_v14, %v1256_v14 }
 0x3ad   :  { %724 = vmatpush.bf16.msra.mxu3 %v715_v19 }
 0x3ae   :  { %1285 = vpow2.f32 %v595_v18  ;;  %v474_v21 = vpop.f32.mrf.mxu1  ;;  %v500_v22 = vpop.f32.mrf.mxu2  ;;  %v355_v18 = vpack.c.bf16 %v1260_v16, %v1260_v16  ;;  %v755_v19 = vunpack.c.l.b16 %v353_v17 }
 0x3af   :  { %v557_v23 = vsel %vm1633_vm8, %v474_v21, -1e+30 }
 0x3b0   :  { %v546_v24 = vpop.f32.mrf.mxu0  ;;  %v573_v25 = vsel %vm362_vm12, %v557_v23, -inf  ;;  %v803_v20 = vunpack.c.l.b16 %v355_v18  ;;  %v756_v21 = vpack.c.b16 %v755_v19, %v755_v19 }
 0x3b1   :  { %574 = vmax.xlane.f32.xlu0 %v573_v25  ;;  %v560_v43 = vsel %vm1633_vm8, %v546_v24, -1e+30 }
 0x3b2   :  { %v582_v45 = vsel %vm362_vm12, %v560_v43, -inf  ;;  %v804_v22 = vpack.c.b16 %v803_v20, %v803_v20 }
 0x3b4   :  { %v1286_v26 = vpop.eup %1285 }
 0x3b5   :  { %v612_v28 = vsel %vm362_vm12, %v1286_v26, 0.0 }
 0x3b6   :  { %v476_v29 = vpop.f32.mrf.mxu1  ;;  %613 = vadd.xlane.f32.xlu1 %v612_v28 }
 0x3b8   :  { %v548_v30 = vpop.f32.mrf.mxu0 }
 0x3b9   :  { %577 = vmax.xlane.f32.xlu0 %v576_v31 }
 0x3c1   :  { %v734_v32 = vpop.permute.xlu1 %733 }
 0x3c2   :  { %v739_v33 = vsel %vm665_vm13, %v734_v32, 0 }
 0x3c3   :  { %748 = vmatpush.bf16.msrb.mxu0 %v739_v33 }
 0x3d6   :  { %v563_v34 = vpop.xlane.xlu0 %562 }
 0x3d7   :  { %v585_v35 = vsub.f32 %v553_v4, %v563_v34 }
 0x3d9   :  { %v593_v36 = vmul.f32 1.442695, %v585_v35 }
 0x3db   :  { %1287 = vpow2.f32 %v593_v36 }
 0x3e1   :  { %v1774_v37 = vpop.eup %1287 }
 0x3e2   :  { %v609_v38 = vsel %vm362_vm12, %v1774_v37, 0.0 }
 0x3e3   :  { %610 = vadd.xlane.f32.xlu2 %v609_v38 }
 0x3eb   :  { %580 = vmax.xlane.f32.xlu2 %v579_v40 }
 0x3f3   :  { %583 = vmax.xlane.f32.xlu2 %v582_v45  ;;  %v1261_v45 = vunpack.i.h.bf16 %v1786_v47 }
 0x3f5   :  { %v356_v49 = vpack.c.bf16 %v1261_v45, %v1261_v45  ;;  %v1217_v45 = vld [vmem:[#allocation5 + $0x8] sm:$0xff] }
 0x40a   :  { %v569_v51 = vpop.xlane.xlu2 %568 }
 0x40b   :  { %v587_v53 = vsub.f32 %v555_v7, %v569_v51  ;;  %660 = vrot.lane.b32.xlu2 %v659_v50, %s1482_s25  ;;  %v827_v50 = vunpack.c.l.b16 %v356_v49 }
 0x40d   :  { %v597_v54 = vmul.f32 1.442695, %v587_v53  ;;  %v828_v51 = vpack.c.b16 %v827_v50, %v827_v50 }
 0x40f   :  { %1289 = vpow2.f32 %v597_v54 }
 0x415   :  { %v1789_v55 = vpop.eup %1289 }
 0x416   :  { %v572_v48 = vpop.xlane.xlu2 %571  ;;  %v615_v56 = vsel %vm362_vm12, %v1789_v55, 0.0 }
 0x417   :  { %v588_v57 = vsub.f32 %v556_v8, %v572_v48  ;;  %616 = vadd.xlane.f32.xlu0 %v615_v56 }
 0x419   :  { %v599_v58 = vmul.f32 1.442695, %v588_v57 }
 0x41b   :  { %1291 = vpow2.f32 %v599_v58 }
 0x421   :  { %v1793_v59 = vpop.eup %1291 }
 0x422   :  { %v618_v62 = vsel %vm362_vm12, %v1793_v59, 0.0 }
 0x423   :  { %619 = vadd.xlane.f32.xlu1 %v618_v62 }
 0x424   :  { %v575_v63 = vpop.xlane.xlu0 %574 }
 0x425   :  { %v589_v3 = vsub.f32 %v557_v23, %v575_v63 }
 0x427   :  { %v601_v4 = vmul.f32 1.442695, %v589_v3 }
 0x429   :  { %1293 = vpow2.f32 %v601_v4  ;;  %v614_v5 = vpop.xlane.xlu1 %613 }
 0x42a   :  { %1295 = vrcp.f32 %v614_v5 }
 0x42c   :  { %v578_v6 = vpop.xlane.xlu0 %577 }
 0x42d   :  { %v590_v7 = vsub.f32 %v558_v27, %v578_v6 }
 0x42f   :  { %v1797_v60 = vpop.eup %1293  ;;  %v603_v61 = vmul.f32 1.442695, %v590_v7 }
 0x430   :  { %v1296_v52 = vpop.eup %1295  ;;  %v621_v1 = vsel %vm362_vm12, %v1797_v60, 0.0 }
 0x431   :  { %v642_v8 = vmul.f32 %v1296_v52, %v1286_v26  ;;  %1297 = vpow2.f32 %v603_v61 }
 0x433   :  { %v650_v44 = vpack.c.bf16 %v642_v8, %v642_v8 }
 0x434   :  { %622 = vadd.xlane.f32.xlu2 %v621_v1 }
 0x435   :  { %1170 = vmatmul.msk.bf16.vlgmr.msra.gmra.mxu2 %vm362_vm12, %v650_v44 }
 0x437   :  { %v1802_v11 = vpop.eup %1297 }
 0x438   :  { %v624_v12 = vsel %vm362_vm12, %v1802_v11, 0.0 }
 0x439   :  { %625 = vadd.xlane.f32.xlu0 %v624_v12 }
 0x44c   :  { %757 = vrot.lane.b32.xlu2 %v756_v21, %s1482_s25 }
 0x44d   :  { %805 = vrot.lane.b32.xlu0 %v804_v22, %s1482_s25 }
 0x456   :  { %v611_v23 = vpop.xlane.xlu2 %610 }
 0x45e   :  { %v581_v24 = vpop.xlane.xlu2 %580 }
 0x45f   :  { %v591_v25 = vsub.f32 %v559_v39, %v581_v24  ;;  %v1255_v39 = vunpack.i.l.bf16 %v1763_v9 }
 0x461   :  { %v605_v26 = vmul.f32 1.442695, %v591_v25 }
 0x463   :  { %1299 = vpow2.f32 %v605_v26 }
 0x464   :  { %1301 = vrcp.f32 %v611_v23 }
 0x466   :  { %v584_v27 = vpop.xlane.xlu2 %583 }
 0x467   :  { %v592_v28 = vsub.f32 %v560_v43, %v584_v27  ;;  %v354_v43 = vpack.c.bf16 %v1255_v39, %v1255_v39 }
 0x469   :  { %v1300_v29 = vpop.eup %1299  ;;  %v607_v30 = vmul.f32 1.442695, %v592_v28  ;;  %v779_v46 = vunpack.c.l.b16 %v354_v43 }
 0x46a   :  { %v1302_v31 = vpop.eup %1301  ;;  %v627_v32 = vsel %vm362_vm12, %v1300_v29, 0.0 }
 0x46b   :  { %628 = vadd.xlane.f32.xlu1 %v627_v32  ;;  %v641_v33 = vmul.f32 %v1302_v31, %v1774_v37  ;;  %1303 = vpow2.f32 %v607_v30  ;;  %v780_v37 = vpack.c.b16 %v779_v46, %v779_v46  ;;  %v1216_v46 = vld [vmem:[#allocation5] sm:$0xff] }
 0x46d   :  { %v649_v36 = vpack.c.bf16 %v641_v33, %v641_v33 }
 0x46e   :  { %v661_v34 = vpop.permute.xlu2 %660 }
 0x46f   :  { %v667_v35 = vsel %vm665_vm13, %v661_v34, 0 }
 0x470   :  { %676 = vmatpush.bf16.msra.mxu1 %v667_v35 }
 0x471   :  { %v1304_v38 = vpop.eup %1303 }
 0x472   :  { %v630_v40 = vsel %vm362_vm12, %v1304_v38, 0.0 }
 0x473   :  { %1169 = vmatmul.msk.bf16.vlgmr.msra.gmra.mxu1 %vm362_vm12, %v649_v36 }
 0x477   :  { %631 = vadd.xlane.f32.xlu0 %v630_v40 }
 0x484   :  { %781 = vrot.lane.b32.xlu1 %v780_v37, %s1482_s25 }
 0x48a   :  { %v617_v53 = vpop.xlane.xlu0 %616 }
 0x48b   :  { %1305 = vrcp.f32 %v617_v53  ;;  %829 = vrot.lane.b32.xlu0 %v828_v51, %s1482_s25 }
 0x491   :  { %v1306_v54 = vpop.eup %1305 }
 0x492   :  { %v643_v9 = vmul.f32 %v1306_v54, %v1789_v55 }
 0x494   :  { %v651_v48 = vpack.c.bf16 %v643_v9, %v643_v9 }
 0x496   :  { %v620_v56 = vpop.xlane.xlu1 %619  ;;  %1171 = vmatmul.msk.bf16.vlgmr.msra.gmra.mxu3 %vm362_vm12, %v651_v48 }
 0x497   :  { %1307 = vrcp.f32 %v620_v56 }
 0x49d   :  { %v1308_v47 = vpop.eup %1307 }
 0x49e   :  { %v644_v57 = vmul.f32 %v1308_v47, %v1793_v59 }
 0x4a0   :  { %v652_v58 = vpack.c.bf16 %v644_v57, %v644_v57 }
 0x4a2   :  { %1172 = vmatmul.msk.bf16.vlgmr.msrb.gmra.mxu0 %vm362_vm12, %v652_v58 }
 0x4a7   :  { %v623_v62 = vpop.xlane.xlu2 %622 }
 0x4a8   :  { %1309 = vrcp.f32 %v623_v62 }
 0x4ac   :  { %v626_v6 = vpop.xlane.xlu0 %625 }
 0x4ae   :  { %v1310_v63 = vpop.eup %1309 }
 0x4af   :  { %v645_v3 = vmul.f32 %v1310_v63, %v1797_v60  ;;  %v758_v4 = vpop.permute.xlu2 %757 }
 0x4b0   :  { %v763_v5 = vsel %vm665_vm13, %v758_v4, 0 }
 0x4b1   :  { %v653_v55 = vpack.c.bf16 %v645_v3, %v645_v3  ;;  %772 = vmatpush.bf16.msrb.mxu1 %v763_v5 }
 0x4b4   :  { %1173 = vmatmul.msk.bf16.vlgmr.msrb.gmra.mxu1 %vm362_vm12, %v653_v55 }
 0x4b5   :  { %908 = vmatpush.bf16.msra.mxu1 %v1217_v45 }
 0x4b8   :  { %v1826_v7 = vpop.f32.mrf.mxu2 }
 0x4b9   :  { %909 = vmatpush.bf16.msra.mxu1 %v1216_v46  ;;  %v1222_v46 = vld [vmem:[%s1910_s8 + $0x10] sm:$0xff] }
 0x4bf   :  { %v806_v61 = vpop.permute.xlu0 %805 }
 0x4c0   :  { %v811_v59 = vsel %vm665_vm13, %v806_v61, 0  ;;  %v704_v52 = vpop.f32.mrf.mxu2 }
 0x4c1   :  { %820 = vmatpush.bf16.msrb.mxu3 %v811_v59 }
 0x4de   :  { %v629_v8 = vpop.xlane.xlu1 %628 }
 0x4df   :  { %1311 = vrcp.f32 %v629_v8 }
 0x4e0   :  { %1313 = vrcp.f32 %v626_v6 }
 0x4e5   :  { %v1312_v44 = vpop.eup %1311 }
 0x4e6   :  { %v647_v1 = vmul.f32 %v1312_v44, %v1300_v29  ;;  %v1314_v16 = vpop.eup %1313 }
 0x4e7   :  { %v646_v17 = vmul.f32 %v1314_v16, %v1802_v11 }
 0x4e8   :  { %v655_v60 = vpack.c.bf16 %v647_v1, %v647_v1 }
 0x4e9   :  { %v654_v22 = vpack.c.bf16 %v646_v17, %v646_v17 }
 0x4ea   :  { %1175 = vmatmul.msk.bf16.vlgmr.msrb.gmra.mxu3 %vm362_vm12, %v655_v60  ;;  %v632_v12 = vpop.xlane.xlu0 %631  ;;  %v1218_v60 = vld [vmem:[#allocation7] sm:$0xff] }
 0x4eb   :  { %1315 = vrcp.f32 %v632_v12 }
 0x4f0   :  { %v678_v14 = vpop.f32.mrf.mxu1 }
 0x4f1   :  { %v1316_v21 = vpop.eup %1315 }
 0x4f2   :  { %v648_v23 = vmul.f32 %v1316_v21, %v1304_v38 }
 0x4f4   :  { %v656_v26 = vpack.c.bf16 %v648_v23, %v648_v23 }
 0x4f6   :  { %v782_v18 = vpop.permute.xlu1 %781 }
 0x4f7   :  { %v787_v19 = vsel %vm665_vm13, %v782_v18, 0 }
 0x4f8   :  { %v680_v20 = vpop.f32.mrf.mxu1  ;;  %796 = vmatpush.bf16.msrb.mxu2 %v787_v19 }
 0x4fb   :  { %1174 = vmatmul.msk.bf16.vlgmr.msrb.gmra.mxu2 %vm362_vm12, %v654_v22 }
 0x4fd   :  { %v830_v24 = vpop.permute.xlu0 %829 }
 0x4fe   :  { %v835_v25 = vsel %vm665_vm13, %v830_v24, 0 }
 0x4ff   :  { %844 = vmatpush.bf16.msra.mxu0 %v835_v25 }
 0x502   :  { %1176 = vmatmul.msk.bf16.vlgmr.msra.gmra.mxu0 %vm362_vm12, %v656_v26 }
 0x519   :  { %v726_v27 = vpop.f32.mrf.mxu3 }
 0x51f   :  { %v750_v28 = vpop.f32.mrf.mxu0 }
 0x520   :  { %v1262_v11 = vpack.i.bf16 %v750_v28, %v726_v27 }
 0x521   :  { %v728_v29 = vpop.f32.mrf.mxu3 }
 0x522   :  { %1263 = vrot.lane.b32.xlu1 %v1262_v11, %s1497_s26  ;;  %v1278_v11 = vld [vmem:[%s1906_s4] ss:$0 sm:$0xff] }
 0x527   :  { %v752_v30 = vpop.f32.mrf.mxu0 }
 0x531   :  { %v774_v31 = vpop.f32.mrf.mxu1 }
 0x539   :  { %v776_v32 = vpop.f32.mrf.mxu1 }
 0x56d   :  { %v822_v33 = vpop.f32.mrf.mxu3 }
 0x575   :  { %v824_v34 = vpop.f32.mrf.mxu3 }
 0x57e   :  { %v798_v35 = vpop.f32.mrf.mxu2 }
 0x57f   :  { %v1267_v36 = vpack.i.bf16 %v798_v35, %v774_v31  ;;  %v846_v38 = vpop.f32.mrf.mxu0 }
 0x580   :  { %v1272_v39 = vpack.i.bf16 %v846_v38, %v822_v33 }
 0x581   :  { %1268 = vrot.lane.b32.xlu2 %v1267_v36, %s1498_s13  ;;  %v1223_v36 = vld [vmem:[%s1910_s8 + $0x18] sm:$0xff] }
 0x582   :  { %1273 = vrot.lane.b32.xlu0 %v1272_v39, %s1499_s14  ;;  %1083 = vmatpush.bf16.msra.mxu3 %v1223_v36 }
 0x586   :  { %v800_v40 = vpop.f32.mrf.mxu2  ;;  %1084 = vmatpush.bf16.msra.mxu3 %v1222_v46 }
 0x587   :  { %v848_v43 = vpop.f32.mrf.mxu0 }
 0x594   :  { %v1264_v49 = vpop.permute.xlu1 %1263 }
 0x595   :  { %v1266_v50 = vunpack.i.h.bf16 %v1264_v49  ;;  %v1265_v51 = vunpack.i.l.bf16 %v1264_v49 }
 0x597   :  { %v874_v48 = vsel %vm362_vm12, %v678_v14, %v1265_v51  ;;  %v875_v56 = vsel %vm362_vm12, %v1826_v7, %v1266_v50 }
 0x5db   :  { %v1269_v37 = vpop.permute.xlu2 %1268 }
 0x5dc   :  { %v1271_v53 = vunpack.i.h.bf16 %v1269_v37  ;;  %v1270_v54 = vunpack.i.l.bf16 %v1269_v37 }
 0x5de   :  { %v878_v58 = vsel %vm876_vm14, %v875_v56, %v1271_v53  ;;  %v877_v62 = vsel %vm876_vm14, %v874_v48, %v1270_v54 }
 0x5f4   :  { %v1274_v9 = vpop.permute.xlu0 %1273 }
 0x5f5   :  { %v1276_v47 = vunpack.i.h.bf16 %v1274_v9  ;;  %v1275_v57 = vunpack.i.l.bf16 %v1274_v9 }
 0x5f7   :  { %v880_v63 = vsel %vm879_vm15, %v877_v62, %v1275_v57  ;;  %v881_v3 = vsel %vm879_vm15, %v878_v58, %v1276_v47  ;;  %vm1075_vm15 = vcmask 523264  }
 0x5f8   :  { %v882_v4 = vpack.c.bf16 %v881_v3, %v880_v63 }
 0x5fa   :  { %1185 = vmatmul.msk.bf16.vlgmr.msra.gmra.mxu1 %vm90_vm0, %v882_v4 }
 0x677   :  { %v911_v5 = vpop.f32.mrf.mxu1 }
 0x678   :  { %v1841_v55 = vadd.f32 %v911_v5, %v1585_v0  ;;  %v1219_v0 = vld [vmem:[#allocation7 + $0x8] sm:$0xff] }
 0x679   :  { %984 = vmatpush.bf16.msra.mxu2 %v1219_v0 }
 0x67a   :  { %v919_v6 = vmul.f32 %v1841_v55, %v1841_v55 }
 0x67c   :  { %v921_v61 = vsel %vm90_vm0, %v919_v6, 0.0 }
 0x67d   :  { %922 = vadd.xlane.f32.xlu1 %v921_v61  ;;  %985 = vmatpush.bf16.msra.mxu2 %v1218_v60 }
 0x67f   :  { %v913_v7 = vpop.f32.mrf.mxu1 }
 0x680   :  { %v1847_v59 = vadd.f32 %v913_v7, %v1592_v2 }
 0x682   :  { %v920_v52 = vmul.f32 %v1847_v59, %v1847_v59 }
 0x684   :  { %v924_v8 = vsel %vm90_vm0, %v920_v52, 0.0 }
 0x685   :  { %925 = vadd.xlane.f32.xlu2 %v924_v8 }
 0x696   :  { %271 = vrot.lane.b32.xlu1 %v1612_v42, %s1482_s25 }
 0x6f0   :  { %v923_v44 = vpop.xlane.xlu1 %922 }
 0x6f1   :  { %v927_v1 = vmul.f32 %v923_v44, %v1598_v13 }
 0x6f3   :  { %v929_v12 = vadd.f32 1e-06, %v927_v1 }
 0x6f5   :  { %1317 = vrsqrt.f32 %v929_v12  ;;  %vm937_vm2 = vweird.f32 %v929_v12 }
 0x6f8   :  { %v926_v2 = vpop.xlane.xlu2 %925 }
 0x6f9   :  { %v928_v14 = vmul.f32 %v926_v2, %v1598_v13 }
 0x6fb   :  { %v1318_v16 = vpop.eup %1317  ;;  %v930_v17 = vadd.f32 1e-06, %v928_v14 }
 0x6fc   :  { %v932_v18 = vmul.f32 %v1318_v16, %v929_v12  ;;  %vm938_vm1 = vweird.f32 %v1318_v16 }
 0x6fd   :  { %1319 = vrsqrt.f32 %v930_v17  ;;  %vm939_vm3 = vmor %vm937_vm2, %vm938_vm1  ;;  %vm947_vm5 = vweird.f32 %v930_v17 }
 0x6fe   :  { %v933_v19 = vmul.f32 %v1318_v16, %v932_v18 }
 0x700   :  { %v934_v20 = vmul.f32 0.5, %v933_v19 }
 0x702   :  { %v935_v21 = vsub.f32 1.5, %v934_v20 }
 0x703   :  { %v1320_v42 = vpop.eup %1319 }
 0x704   :  { %v942_v22 = vmul.f32 %v1320_v42, %v930_v17  ;;  %v936_v23 = vmul.f32 %v1318_v16, %v935_v21  ;;  %vm948_vm4 = vweird.f32 %v1320_v42 }
 0x705   :  { %vm949_vm6 = vmor %vm947_vm5, %vm948_vm4 }
 0x706   :  { %v943_v24 = vmul.f32 %v1320_v42, %v942_v22  ;;  %v940_v27 = vsel %vm939_vm3, %v1318_v16, %v936_v23 }
 0x707   :  { %v951_v29 = vmul.f32 %v940_v27, %v1841_v55 }
 0x708   :  { %v944_v25 = vmul.f32 0.5, %v943_v24  ;;  %v272_v26 = vpop.permute.xlu1 %271 }
 0x709   :  { %276 = vst.msk [vmem:[#allocation11 + $0x8] sm:$0xff] %vm90_vm0, %v272_v26  ;;  %v956_v32 = vmul.f32 %v1278_v11, %v951_v29 }
 0x70a   :  { %v945_v13 = vsub.f32 1.5, %v944_v25 }
 0x70c   :  { %v946_v28 = vmul.f32 %v1320_v42, %v945_v13 }
 0x70e   :  { %v950_v30 = vsel %vm949_vm6, %v1320_v42, %v946_v28 }
 0x70f   :  { %v952_v31 = vmul.f32 %v950_v30, %v1847_v59 }
 0x711   :  { %v957_v33 = vmul.f32 %v1278_v11, %v952_v31 }
 0x713   :  { %v958_v34 = vpack.c.bf16 %v957_v33, %v956_v32 }
 0x715   :  { %1194 = vmatmul.msk.bf16.vlgmr.msra.gmra.mxu2 %vm90_vm0, %v958_v34 }
 0x798   :  { %v987_v35 = vpop.f32.mrf.mxu2 }
 0x799   :  { %1034 = vrot.lane.b32.xlu0 %v987_v35, %s1482_s25  ;;  %v1195_v39 = vmul.f32 -1.442695, %v987_v35 }
 0x79b   :  { %1321 = vpow2.f32 %v1195_v39 }
 0x7a0   :  { %v989_v38 = vpop.f32.mrf.mxu2 }
 0x7a1   :  { %1036 = vrot.lane.b32.xlu0 %v989_v38, %s1482_s25  ;;  %v1196_v40 = vmul.f32 -1.442695, %v989_v38  ;;  %v1322_v43 = vpop.eup %1321 }
 0x7a2   :  { %v998_v49 = vadd.f32 1.0, %v1322_v43 }
 0x7a3   :  { %1323 = vpow2.f32 %v1196_v40 }
 0x7a4   :  { %1325 = vrcp.f32 %v998_v49  ;;  %vm1005_vm9 = vweird.f32 %v998_v49  ;;  %v1011_v62 = vand.u32 2147483648, %v998_v49  ;;  %v1009_v3 = vand.u32 2147483647, %v998_v49 }
 0x7a6   :  { %v1012_v7 = vor.u32 1.1754944e-38, %v1011_v62  ;;  %vm1010_vm14 = vcmp.eq.f32.partialorder %v1009_v3, 8.507059e+37 }
 0x7a9   :  { %261 = vrot.lane.b32.xlu0 %v1669_v10, %s1496_s12  ;;  %v1324_v45 = vpop.eup %1323  ;;  %v1221_v10 = vld [vmem:[%s1910_s8 + $0x8] sm:$0xff] }
 0x7aa   :  { %1085 = vmatpush.bf16.msra.mxu3 %v1221_v10  ;;  %v1326_v37 = vpop.eup %1325 }
 0x7ab   :  { %v1001_v53 = vmul.f32 %v1326_v37, %v998_v49  ;;  %vm1006_vm7 = vweird.f32 %v1326_v37 }
 0x7ac   :  { %vm1007_vm11 = vmor %vm1005_vm9, %vm1006_vm7 }
 0x7ad   :  { %v1002_v9 = vsub.f32 1.0, %v1001_v53 }
 0x7af   :  { %v1003_v56 = vmul.f32 %v1326_v37, %v1002_v9 }
 0x7b1   :  { %263 = vrot.lane.b32.xlu0 %v1678_v15, %s1496_s12  ;;  %v999_v15 = vadd.f32 1.0, %v1324_v45  ;;  %v1004_v57 = vadd.f32 %v1326_v37, %v1003_v56  ;;  %s1103_s12 = sshll.u32 %s1911_s9, 4  ;;  %s1104_s12 = int_to_ptr.hbm [resolvable:$true] %s1103_s12 }
 0x7b3   :  { %1327 = vrcp.f32 %v999_v15  ;;  %v1026_v58 = vand.u32 2147483648, %v999_v15  ;;  %vm1020_vm10 = vweird.f32 %v999_v15  ;;  %v1024_v63 = vand.u32 2147483647, %v999_v15 }
 0x7b4   :  { %v1008_v6 = vsel %vm1007_vm11, %v1326_v37, %v1004_v57 }
 0x7b5   :  { %v1027_v61 = vor.u32 1.1754944e-38, %v1026_v58  ;;  %vm1025_vm13 = vcmp.eq.f32.partialorder %v1024_v63, 8.507059e+37  ;;  %v1013_v8 = vsel %vm1010_vm14, %v1012_v7, %v1008_v6 }
 0x7b6   :  { %v1030_v44 = vmul.f32 %v1013_v8, %v987_v35 }
 0x7b9   :  { %269 = vrot.lane.b32.xlu0 %v1608_v41, %s1482_s25  ;;  %v1220_v41 = vld [vmem:[%s1910_s8] sm:$0xff]  ;;  %v1328_v50 = vpop.eup %1327  ;;  %s1500_s8 = smov [#allocation9]  }
 0x7ba   :  { %1086 = vmatpush.bf16.msra.mxu3 %v1220_v41  ;;  %v1016_v51 = vmul.f32 %v1328_v50, %v999_v15  ;;  %vm1021_vm8 = vweird.f32 %v1328_v50  ;;  %s1114_s20 = sshll.u32 %s1500_s8, 4  ;;  %s1115_s20 = int_to_ptr.vmem [resolvable:$true] %s1114_s20 }
 0x7bb   :  { %vm1022_vm12 = vmor %vm1020_vm10, %vm1021_vm8 }
 0x7bc   :  { %v1017_v54 = vsub.f32 1.0, %v1016_v51 }
 0x7be   :  { %v1018_v48 = vmul.f32 %v1328_v50, %v1017_v54 }
 0x7c0   :  { %v1019_v47 = vadd.f32 %v1328_v50, %v1018_v48 }
 0x7c2   :  { %v1023_v5 = vsel %vm1022_vm12, %v1328_v50, %v1019_v47 }
 0x7c3   :  { %v1028_v52 = vsel %vm1025_vm13, %v1027_v61, %v1023_v5 }
 0x7c4   :  { %v1031_v0 = vmul.f32 %v1028_v52, %v989_v38 }
 0x80b   :  { %v1035_v4 = vpop.permute.xlu0 %1034 }
 0x80c   :  { %v1040_v60 = vmul.f32 %v1035_v4, %v1030_v44 }
 0x813   :  { %v1037_v1 = vpop.permute.xlu0 %1036 }
 0x814   :  { %v1041_v12 = vmul.f32 %v1037_v1, %v1031_v0 }
 0x816   :  { %v1042_v2 = vpack.c.bf16 %v1041_v12, %v1040_v60 }
 0x818   :  { %1213 = vmatmul.msk.bf16.vlgmr.msra.gmra.mxu3 %vm1075_vm15, %v1042_v2 }
 0x81b   :  { %v262_v14 = vpop.permute.xlu0 %261 }
 0x81c   :  { %267 = vst.msk [vmem:[#allocation9] sm:$0xff] %vm90_vm0, %v262_v14 }
 0x823   :  { %v264_v16 = vpop.permute.xlu0 %263 }
 0x824   :  { %268 = vst.msk [vmem:[#allocation9 + $0x8] sm:$0xff] %vm90_vm0, %v264_v16 }
 0x825   :  { %1122 = dma.vmem_to_hbm [thread:$0]  %s1115_s20, 256, %s1117_s23, [#allocation10], %s1501_s24, %s1501_s24, %s1497_s26  }
 0x82b   :  { %v270_v17 = vpop.permute.xlu0 %269 }
 0x82c   :  { %275 = vst.msk [vmem:[#allocation11] sm:$0xff] %vm90_vm0, %v270_v17 }
 0x82d   :  { %1135 = dma.vmem_to_hbm [thread:$0]  %s1128_s30, 256, %s1130_s28, [#allocation10], %s1501_s24, %s1501_s24, %s1497_s26  }
 0x89b   :  { %v1088_v18 = vpop.f32.mrf.mxu3 }
 0x89c   :  { %v1093_v19 = vadd.f32 %v1088_v18, %v1841_v55 }
 0x89e   :  { %1095 = vst.msk [vmem:[#allocation8] sm:$0xff] %vm90_vm0, %v1093_v19 }
 0x8a3   :  { %v1090_v20 = vpop.f32.mrf.mxu3 }
 0x8a4   :  { %v1094_v21 = vadd.f32 %v1090_v20, %v1847_v59 }
 0x8a6   :  { %1096 = vst.msk [vmem:[#allocation8 + $0x8] sm:$0xff] %vm90_vm0, %v1094_v21 }
 0x8a7   :  { %1109 = dma.vmem_to_hbm [thread:$0]  %s1102_s2, 256, %s1104_s12, [#allocation4], %s1501_s24, %s1501_s24, %s1497_s26  }
 0x8a8   :  { %1477 = dma.done.wait [#allocation4], 256  }
 0x8a9   :  { %1478 = vsyncadd [#allocation4], 4294967040 }
 0x8aa   :  { %1479 = dma.done.wait [#allocation10], 512  }
 0x8ab   :  { %1480 = vsyncadd [#allocation10], 4294966784 }
 0x8ac   :  { %1148 = vsyncpa [#allocation3], 1 }
 0x8ad   :  { %1149 = vsyncpa [#allocation6], 1 }
 0x8ae   :  { %1150 = vsyncpa [#allocation4], 1 }
 0x8af   :  { %1151 = vsyncpa [#allocation10], 1 }

</bundles_post_ra>
